<compile_context>
chip_gen: v5e
topology: v5e:2x2
jax: 0.10.0
libtpu: 0.0.40
codegen_flags: <defaults>
</compile_context>

<pallas_src>
import functools

import jax
import jax.numpy as jnp
from jax.experimental import pallas as pl
from jax.experimental.pallas import tpu as pltpu

LANE = 128


def _round_up(x, m):
    return (x + m - 1) // m * m


def _pick_row_tile(ho, target=8):
    """Largest divisor of `ho` that is <= target (keeps row blocks exact)."""
    best = 1
    for d in range(1, min(ho, target) + 1):
        if ho % d == 0:
            best = d
    return best


# -----------------------------------------------------------------------------
# Fused kernel: depthwise conv + BN  ->  pointwise 1x1 conv + BN + hardswish
# -----------------------------------------------------------------------------
def _fused_dwconv_kernel(x_hbm, w_dw_ref, dw_shift_ref, w_pw_ref, pw_shift_ref,
                         o_ref, xwin_ref, dma_sem, *, K, stride, TH, Wo):
    # x_hbm:        (N, Hp, Wp, Cp)   padded input, left in HBM (pl.ANY)
    # w_dw_ref:     (K, K, Cp)        depthwise weight, BN scale folded in
    # dw_shift_ref: (1, Cp)           depthwise BN shift
    # w_pw_ref:     (Cp, Cop) bf16    pointwise weight, BN scale folded in
    # pw_shift_ref: (1, Cop)          pointwise BN shift
    # o_ref:        (1, TH, Wo, Cop)  output row-tile
    # xwin_ref:     (TH_in, Wp, Cp)   VMEM scratch for the input row window
    n = pl.program_id(0)
    r = pl.program_id(1)
    TH_in = (TH - 1) * stride + K
    h0 = pl.multiple_of(r * (TH * stride), TH * stride)

    # Bring the input row window (TH output rows + K-1 halo rows) into VMEM.
    cp = pltpu.make_async_copy(x_hbm.at[n, pl.ds(h0, TH_in)], xwin_ref, dma_sem)
    cp.start()
    cp.wait()

    xwin = xwin_ref[...].astype(jnp.float32)          # (TH_in, Wp, Cp)
    Cp = xwin.shape[-1]

    # Depthwise conv (+ folded BN scale), accumulate in f32 on the VPU.
    acc = jnp.zeros((TH, Wo, Cp), jnp.float32)
    for kh in range(K):
        for kw in range(K):
            # TODO(synk): for stride > 1 the W striding should be moved into
            # the DMA / layout instead of an in-VMEM strided slice.
            win = jax.lax.slice(
                xwin,
                (kh, kw, 0),
                (kh + (TH - 1) * stride + 1, kw + (Wo - 1) * stride + 1, Cp),
                (stride, stride, 1))                   # (TH, Wo, Cp)
            acc = acc + win * w_dw_ref[kh, kw, :].astype(jnp.float32)
    y = acc + dw_shift_ref[0].astype(jnp.float32)      # no activation (no_depth_act)

    # Pointwise 1x1 conv on the MXU: bf16 inputs, f32 accumulation.
    a = y.astype(jnp.bfloat16).reshape(TH * Wo, Cp)
    z = jnp.dot(a, w_pw_ref[...], preferred_element_type=jnp.float32)
    z = z + pw_shift_ref[...].astype(jnp.float32)
    # Hardswish: x * relu6(x + 3) / 6
    z = z * jnp.clip(z + 3.0, 0.0, 6.0) * (1.0 / 6.0)

    Cop = z.shape[-1]
    o_ref[0] = z.reshape(TH, Wo, Cop).astype(o_ref.dtype)


def dwconv_forward(x_nchw, kparams, *, ksize, stride):
    w_dw = kparams["w_dw"]          # (K, K, Cp)
    dw_shift = kparams["dw_shift"]  # (1, Cp)
    w_pw = kparams["w_pw"]          # (Cp, Cop) bf16
    pw_shift = kparams["pw_shift"]  # (1, Cop)
    cout = kparams["out_channels"]

    x = jnp.transpose(x_nchw, (0, 2, 3, 1))            # NCHW -> NHWC
    # TODO(synk): keep activations NHWC across layers to drop these transposes.
    N, H, W, Cin = x.shape
    K = ksize
    pad = (K - 1) // 2
    Ho = (H + 2 * pad - K) // stride + 1
    Wo = (W + 2 * pad - K) // stride + 1
    Cp = w_dw.shape[-1]
    Cop = w_pw.shape[-1]

    # Zero-pad: spatial halo + channel pad up to a lane-dense multiple of 128.
    # TODO(synk): the spatial halo could be built in-kernel (masked DMA) to
    # avoid this extra HBM pass over the input.
    xp = jnp.pad(x, ((0, 0), (pad, pad), (pad, pad), (0, Cp - Cin)))
    Hp, Wp = H + 2 * pad, W + 2 * pad

    TH = _pick_row_tile(Ho, target=8)                  # rows per grid step
    TH_in = (TH - 1) * stride + K
    num_r = Ho // TH

    kernel = functools.partial(_fused_dwconv_kernel, K=K, stride=stride,
                               TH=TH, Wo=Wo)

    out = pl.pallas_call(
        kernel,
        out_shape=jax.ShapeDtypeStruct((N, Ho, Wo, Cop), x.dtype),
        grid_spec=pltpu.PrefetchScalarGridSpec(
            num_scalar_prefetch=0,
            grid=(N, num_r),
            in_specs=[
                pl.BlockSpec(memory_space=pl.ANY),                 # x (HBM)
                pl.BlockSpec((K, K, Cp), lambda n, r: (0, 0, 0)),  # w_dw
                pl.BlockSpec((1, Cp), lambda n, r: (0, 0)),        # dw_shift
                pl.BlockSpec((Cp, Cop), lambda n, r: (0, 0)),      # w_pw
                pl.BlockSpec((1, Cop), lambda n, r: (0, 0)),       # pw_shift
            ],
            out_specs=pl.BlockSpec((1, TH, Wo, Cop),
                                   lambda n, r: (n, r, 0, 0)),
            scratch_shapes=[
                pltpu.VMEM((TH_in, Wp, Cp), x.dtype),
                pltpu.SemaphoreType.DMA(()),
            ],
        ),
        compiler_params=pltpu.CompilerParams(
            dimension_semantics=("parallel", "parallel")),
    )(xp, w_dw, dw_shift, w_pw, pw_shift)

    out = out[..., :cout]                              # drop channel padding
    return jnp.transpose(out, (0, 3, 1, 2))            # NHWC -> NCHW


# -----------------------------------------------------------------------------
# Parameters (PyTorch-equivalent, eval-mode BN) and kernel-ready folding
# -----------------------------------------------------------------------------
def init_params(key, in_channels, out_channels, ksize, eps=1e-5):
    k1, k2, k3, k4, k5, k6 = jax.random.split(key, 6)
    # depthwise conv weight: torch (Cin, 1, K, K) -> (K, K, Cin)
    w_dw = jax.random.normal(k1, (ksize, ksize, in_channels), jnp.float32) * 0.1
    # pointwise 1x1 conv weight: torch (Cout, Cin, 1, 1) -> (Cin, Cout)
    w_pw = jax.random.normal(k2, (in_channels, out_channels), jnp.float32) * 0.1

    dw_gamma = 1.0 + 0.1 * jax.random.normal(k3, (in_channels,), jnp.float32)
    dw_beta = 0.1 * jax.random.normal(k4, (in_channels,), jnp.float32)
    dw_mean = jnp.zeros((in_channels,), jnp.float32)
    dw_var = jnp.ones((in_channels,), jnp.float32)

    pw_gamma = 1.0 + 0.1 * jax.random.normal(k5, (out_channels,), jnp.float32)
    pw_beta = 0.1 * jax.random.normal(k6, (out_channels,), jnp.float32)
    pw_mean = jnp.zeros((out_channels,), jnp.float32)
    pw_var = jnp.ones((out_channels,), jnp.float32)

    dw_scale = dw_gamma / jnp.sqrt(dw_var + eps)
    dw_shift = dw_beta - dw_mean * dw_scale
    pw_scale = pw_gamma / jnp.sqrt(pw_var + eps)
    pw_shift = pw_beta - pw_mean * pw_scale

    return {"w_dw": w_dw, "w_pw": w_pw,
            "dw_scale": dw_scale, "dw_shift": dw_shift,
            "pw_scale": pw_scale, "pw_shift": pw_shift}


def prepare_kernel_params(raw):
    """Fold BN scales into conv weights and pad channels to 128 lanes."""
    w_dw = raw["w_dw"]
    cin = w_dw.shape[-1]
    cout = raw["w_pw"].shape[-1]
    Cp = _round_up(cin, LANE)
    Cop = _round_up(cout, LANE)

    w_dw_f = w_dw * raw["dw_scale"][None, None, :]
    w_pw_f = raw["w_pw"] * raw["pw_scale"][None, :]

    w_dw_f = jnp.pad(w_dw_f, ((0, 0), (0, 0), (0, Cp - cin)))
    w_pw_f = jnp.pad(w_pw_f, ((0, Cp - cin), (0, Cop - cout))).astype(jnp.bfloat16)
    dw_shift = jnp.pad(raw["dw_shift"], ((0, Cp - cin),)).reshape(1, Cp)
    pw_shift = jnp.pad(raw["pw_shift"], ((0, Cop - cout),)).reshape(1, Cop)

    return {"w_dw": w_dw_f, "dw_shift": dw_shift,
            "w_pw": w_pw_f, "pw_shift": pw_shift,
            "out_channels": cout}


# -----------------------------------------------------------------------------
# Pure-JAX reference (same eval-mode semantics) for a loose sanity check
# -----------------------------------------------------------------------------
def reference_forward(x_nchw, raw, *, ksize, stride):
    x = jnp.transpose(x_nchw, (0, 2, 3, 1))
    cin = x.shape[-1]
    pad = (ksize - 1) // 2
    dn = ("NHWC", "HWIO", "NHWC")
    y = jax.lax.conv_general_dilated(
        x, raw["w_dw"].reshape(ksize, ksize, 1, cin),
        window_strides=(stride, stride), padding=((pad, pad), (pad, pad)),
        feature_group_count=cin, dimension_numbers=dn)
    y = y * raw["dw_scale"] + raw["dw_shift"]          # dconv BN, no act
    z = jax.lax.conv_general_dilated(
        y, raw["w_pw"].reshape(1, 1, *raw["w_pw"].shape),
        window_strides=(1, 1), padding=((0, 0), (0, 0)), dimension_numbers=dn)
    z = z * raw["pw_scale"] + raw["pw_shift"]          # pconv BN
    z = z * jnp.clip(z + 3.0, 0.0, 6.0) / 6.0          # hardswish
    return jnp.transpose(z, (0, 3, 1, 2))


if __name__ == "__main__":
    key = jax.random.PRNGKey(0)
    kx, kp = jax.random.split(key)

    N, Cin, H, W = 2, 4, 16, 16
    Cout, ksize, stride = 8, 3, 1

    x = jax.random.normal(kx, (N, Cin, H, W), jnp.float32)   # NCHW like PyTorch
    raw = init_params(kp, Cin, Cout, ksize)
    kparams = prepare_kernel_params(raw)

    out = dwconv_forward(x, kparams, ksize=ksize, stride=stride)
    out = jax.block_until_ready(out)
    assert out.shape == (N, Cout, H // stride, W // stride), out.shape

    ref = jax.block_until_ready(reference_forward(x, raw, ksize=ksize, stride=stride))
    max_err = float(jnp.max(jnp.abs(out - ref)))
    assert max_err < 5e-2, f"max abs err {max_err}"   # loose: bf16 MXU path

    print("KERNEL_OK")
</pallas_src>

<mosaic_0001>
module attributes {stable_mosaic.version = 11 : i64} {
  func.func @_fused_dwconv_kernel(%arg0: i32, %arg1: i32, %arg2: memref<2x18x18x128xf32, #tpu.memory_space<any>>, %arg3: memref<3x3x128xf32, #tpu.memory_space<vmem>>, %arg4: memref<1x128xf32, #tpu.memory_space<vmem>>, %arg5: memref<128x128xbf16, #tpu.memory_space<vmem>>, %arg6: memref<1x128xf32, #tpu.memory_space<vmem>>, %arg7: memref<1x8x16x128xf32, #tpu.memory_space<vmem>>, %arg8: memref<10x18x128xf32, #tpu.memory_space<vmem>>, %arg9: memref<!tpu.dma_semaphore, #tpu.memory_space<semaphore_mem>>) attributes {dimension_semantics = [#tpu.dimension_semantics<parallel>, #tpu.dimension_semantics<parallel>], iteration_bounds = array<i64: 2, 2>, scalar_prefetch = 0 : i64, scratch_operands = 2 : i64, tpu.core_type = #tpu.core_type<tc>, window_params = [{}, {pipeline_mode = #tpu.pipeline_mode<synchronous>, transform_indices = @transform_1, window_bounds = array<i64: 3, 3, 128>}, {pipeline_mode = #tpu.pipeline_mode<synchronous>, transform_indices = @transform_2, window_bounds = array<i64: 1, 128>}, {pipeline_mode = #tpu.pipeline_mode<synchronous>, transform_indices = @transform_3, window_bounds = array<i64: 128, 128>}, {pipeline_mode = #tpu.pipeline_mode<synchronous>, transform_indices = @transform_4, window_bounds = array<i64: 1, 128>}, {transform_indices = @transform_5, window_bounds = array<i64: 1, 8, 16, 128>}]} {
    %c8_i32 = arith.constant 8 : i32
    %0 = arith.muli %arg1, %c8_i32 : i32
    %1 = tpu.assume_multiple %0, 8 : i32
    %c0_i32 = arith.constant 0 : i32
    %c0_i32_0 = arith.constant 0 : i32
    %2 = tpu.memref_slice %arg2[%arg0, %1, %c0_i32, %c0_i32_0] : memref<2x18x18x128xf32, #tpu.memory_space<any>> -> memref<1x10x18x128xf32, #tpu.memory_space<any>>
    %3 = tpu.memref_squeeze %2 : memref<1x10x18x128xf32, #tpu.memory_space<any>> -> memref<10x18x128xf32, #tpu.memory_space<any>>
    tpu.enqueue_dma source(%3 : memref<10x18x128xf32, #tpu.memory_space<any>>) target(%arg8 : memref<10x18x128xf32, #tpu.memory_space<vmem>>) target_semaphore(%arg9 : memref<!tpu.dma_semaphore, #tpu.memory_space<semaphore_mem>>)
    %c0_i32_1 = arith.constant 0 : i32
    %c0_i32_2 = arith.constant 0 : i32
    %4 = tpu.memref_slice %arg2[%arg0, %1, %c0_i32_1, %c0_i32_2] : memref<2x18x18x128xf32, #tpu.memory_space<any>> -> memref<1x10x18x128xf32, #tpu.memory_space<any>>
    %5 = tpu.memref_squeeze %4 : memref<1x10x18x128xf32, #tpu.memory_space<any>> -> memref<10x18x128xf32, #tpu.memory_space<any>>
    tpu.wait_dma2 semaphore(%arg9 : memref<!tpu.dma_semaphore, #tpu.memory_space<semaphore_mem>>) src(%5 : memref<10x18x128xf32, #tpu.memory_space<any>>) dst(%arg8 : memref<10x18x128xf32, #tpu.memory_space<vmem>>)
    %c0 = arith.constant 0 : index
    %c0_3 = arith.constant 0 : index
    %c0_4 = arith.constant 0 : index
    %6 = vector.load %arg8[%c0, %c0_3, %c0_4] : memref<10x18x128xf32, #tpu.memory_space<vmem>>, vector<10x18x128xf32>
    %cst = arith.constant 0.000000e+00 : f32
    %7 = vector.broadcast %cst : f32 to vector<8x16x128xf32>
    %8 = vector.extract_strided_slice %6 {offsets = [0, 0, 0], sizes = [8, 16, 128], strides = [1, 1, 1]} : vector<10x18x128xf32> to vector<8x16x128xf32>
    %c0_5 = arith.constant 0 : index
    %c0_6 = arith.constant 0 : index
    %c0_7 = arith.constant 0 : index
    %9 = vector.load %arg3[%c0_5, %c0_6, %c0_7] : memref<3x3x128xf32, #tpu.memory_space<vmem>>, vector<1x1x128xf32>
    %10 = vector.shape_cast %9 : vector<1x1x128xf32> to vector<128xf32>
    %11 = vector.shape_cast %10 : vector<128xf32> to vector<1x1x128xf32>
    %12 = vector.broadcast %11 : vector<1x1x128xf32> to vector<8x16x128xf32>
    %13 = arith.mulf %8, %12 : vector<8x16x128xf32>
    %14 = arith.addf %7, %13 : vector<8x16x128xf32>
    %15 = vector.extract_strided_slice %6 {offsets = [0, 1, 0], sizes = [8, 16, 128], strides = [1, 1, 1]} : vector<10x18x128xf32> to vector<8x16x128xf32>
    %c0_8 = arith.constant 0 : index
    %c1 = arith.constant 1 : index
    %c0_9 = arith.constant 0 : index
    %16 = vector.load %arg3[%c0_8, %c1, %c0_9] : memref<3x3x128xf32, #tpu.memory_space<vmem>>, vector<1x1x128xf32>
    %17 = vector.shape_cast %16 : vector<1x1x128xf32> to vector<128xf32>
    %18 = vector.shape_cast %17 : vector<128xf32> to vector<1x1x128xf32>
    %19 = vector.broadcast %18 : vector<1x1x128xf32> to vector<8x16x128xf32>
    %20 = arith.mulf %15, %19 : vector<8x16x128xf32>
    %21 = arith.addf %14, %20 : vector<8x16x128xf32>
    %22 = vector.extract_strided_slice %6 {offsets = [0, 2, 0], sizes = [8, 16, 128], strides = [1, 1, 1]} : vector<10x18x128xf32> to vector<8x16x128xf32>
    %c0_10 = arith.constant 0 : index
    %c2 = arith.constant 2 : index
    %c0_11 = arith.constant 0 : index
    %23 = vector.load %arg3[%c0_10, %c2, %c0_11] : memref<3x3x128xf32, #tpu.memory_space<vmem>>, vector<1x1x128xf32>
    %24 = vector.shape_cast %23 : vector<1x1x128xf32> to vector<128xf32>
    %25 = vector.shape_cast %24 : vector<128xf32> to vector<1x1x128xf32>
    %26 = vector.broadcast %25 : vector<1x1x128xf32> to vector<8x16x128xf32>
    %27 = arith.mulf %22, %26 : vector<8x16x128xf32>
    %28 = arith.addf %21, %27 : vector<8x16x128xf32>
    %29 = vector.extract_strided_slice %6 {offsets = [1, 0, 0], sizes = [8, 16, 128], strides = [1, 1, 1]} : vector<10x18x128xf32> to vector<8x16x128xf32>
    %c1_12 = arith.constant 1 : index
    %c0_13 = arith.constant 0 : index
    %c0_14 = arith.constant 0 : index
    %30 = vector.load %arg3[%c1_12, %c0_13, %c0_14] : memref<3x3x128xf32, #tpu.memory_space<vmem>>, vector<1x1x128xf32>
    %31 = vector.shape_cast %30 : vector<1x1x128xf32> to vector<128xf32>
    %32 = vector.shape_cast %31 : vector<128xf32> to vector<1x1x128xf32>
    %33 = vector.broadcast %32 : vector<1x1x128xf32> to vector<8x16x128xf32>
    %34 = arith.mulf %29, %33 : vector<8x16x128xf32>
    %35 = arith.addf %28, %34 : vector<8x16x128xf32>
    %36 = vector.extract_strided_slice %6 {offsets = [1, 1, 0], sizes = [8, 16, 128], strides = [1, 1, 1]} : vector<10x18x128xf32> to vector<8x16x128xf32>
    %c1_15 = arith.constant 1 : index
    %c1_16 = arith.constant 1 : index
    %c0_17 = arith.constant 0 : index
    %37 = vector.load %arg3[%c1_15, %c1_16, %c0_17] : memref<3x3x128xf32, #tpu.memory_space<vmem>>, vector<1x1x128xf32>
    %38 = vector.shape_cast %37 : vector<1x1x128xf32> to vector<128xf32>
    %39 = vector.shape_cast %38 : vector<128xf32> to vector<1x1x128xf32>
    %40 = vector.broadcast %39 : vector<1x1x128xf32> to vector<8x16x128xf32>
    %41 = arith.mulf %36, %40 : vector<8x16x128xf32>
    %42 = arith.addf %35, %41 : vector<8x16x128xf32>
    %43 = vector.extract_strided_slice %6 {offsets = [1, 2, 0], sizes = [8, 16, 128], strides = [1, 1, 1]} : vector<10x18x128xf32> to vector<8x16x128xf32>
    %c1_18 = arith.constant 1 : index
    %c2_19 = arith.constant 2 : index
    %c0_20 = arith.constant 0 : index
    %44 = vector.load %arg3[%c1_18, %c2_19, %c0_20] : memref<3x3x128xf32, #tpu.memory_space<vmem>>, vector<1x1x128xf32>
    %45 = vector.shape_cast %44 : vector<1x1x128xf32> to vector<128xf32>
    %46 = vector.shape_cast %45 : vector<128xf32> to vector<1x1x128xf32>
    %47 = vector.broadcast %46 : vector<1x1x128xf32> to vector<8x16x128xf32>
    %48 = arith.mulf %43, %47 : vector<8x16x128xf32>
    %49 = arith.addf %42, %48 : vector<8x16x128xf32>
    %50 = vector.extract_strided_slice %6 {offsets = [2, 0, 0], sizes = [8, 16, 128], strides = [1, 1, 1]} : vector<10x18x128xf32> to vector<8x16x128xf32>
    %c2_21 = arith.constant 2 : index
    %c0_22 = arith.constant 0 : index
    %c0_23 = arith.constant 0 : index
    %51 = vector.load %arg3[%c2_21, %c0_22, %c0_23] : memref<3x3x128xf32, #tpu.memory_space<vmem>>, vector<1x1x128xf32>
    %52 = vector.shape_cast %51 : vector<1x1x128xf32> to vector<128xf32>
    %53 = vector.shape_cast %52 : vector<128xf32> to vector<1x1x128xf32>
    %54 = vector.broadcast %53 : vector<1x1x128xf32> to vector<8x16x128xf32>
    %55 = arith.mulf %50, %54 : vector<8x16x128xf32>
    %56 = arith.addf %49, %55 : vector<8x16x128xf32>
    %57 = vector.extract_strided_slice %6 {offsets = [2, 1, 0], sizes = [8, 16, 128], strides = [1, 1, 1]} : vector<10x18x128xf32> to vector<8x16x128xf32>
    %c2_24 = arith.constant 2 : index
    %c1_25 = arith.constant 1 : index
    %c0_26 = arith.constant 0 : index
    %58 = vector.load %arg3[%c2_24, %c1_25, %c0_26] : memref<3x3x128xf32, #tpu.memory_space<vmem>>, vector<1x1x128xf32>
    %59 = vector.shape_cast %58 : vector<1x1x128xf32> to vector<128xf32>
    %60 = vector.shape_cast %59 : vector<128xf32> to vector<1x1x128xf32>
    %61 = vector.broadcast %60 : vector<1x1x128xf32> to vector<8x16x128xf32>
    %62 = arith.mulf %57, %61 : vector<8x16x128xf32>
    %63 = arith.addf %56, %62 : vector<8x16x128xf32>
    %64 = vector.extract_strided_slice %6 {offsets = [2, 2, 0], sizes = [8, 16, 128], strides = [1, 1, 1]} : vector<10x18x128xf32> to vector<8x16x128xf32>
    %c2_27 = arith.constant 2 : index
    %c2_28 = arith.constant 2 : index
    %c0_29 = arith.constant 0 : index
    %65 = vector.load %arg3[%c2_27, %c2_28, %c0_29] : memref<3x3x128xf32, #tpu.memory_space<vmem>>, vector<1x1x128xf32>
    %66 = vector.shape_cast %65 : vector<1x1x128xf32> to vector<128xf32>
    %67 = vector.shape_cast %66 : vector<128xf32> to vector<1x1x128xf32>
    %68 = vector.broadcast %67 : vector<1x1x128xf32> to vector<8x16x128xf32>
    %69 = arith.mulf %64, %68 : vector<8x16x128xf32>
    %70 = arith.addf %63, %69 : vector<8x16x128xf32>
    %c0_30 = arith.constant 0 : index
    %c0_31 = arith.constant 0 : index
    %71 = vector.load %arg4[%c0_30, %c0_31] : memref<1x128xf32, #tpu.memory_space<vmem>>, vector<1x128xf32>
    %72 = vector.shape_cast %71 : vector<1x128xf32> to vector<128xf32>
    %73 = vector.shape_cast %72 : vector<128xf32> to vector<1x1x128xf32>
    %74 = vector.broadcast %73 : vector<1x1x128xf32> to vector<8x16x128xf32>
    %75 = arith.addf %70, %74 : vector<8x16x128xf32>
    %76 = arith.truncf %75 : vector<8x16x128xf32> to vector<8x16x128xbf16>
    %77 = vector.shape_cast %76 : vector<8x16x128xbf16> to vector<128x128xbf16>
    %c0_32 = arith.constant 0 : index
    %c0_33 = arith.constant 0 : index
    %78 = vector.load %arg5[%c0_32, %c0_33] : memref<128x128xbf16, #tpu.memory_space<vmem>>, vector<128x128xbf16>
    %cst_34 = arith.constant dense<0.000000e+00> : vector<128x128xf32>
    %79 = tpu.matmul %77, %78, %cst_34 {dimension_numbers = #tpu.dot_dimension_numbers<[1], [0], [0], [1], [0, 0, 1, 1], [], []>} : vector<128x128xbf16>, vector<128x128xbf16>, vector<128x128xf32> -> vector<128x128xf32>
    %c0_35 = arith.constant 0 : index
    %c0_36 = arith.constant 0 : index
    %80 = vector.load %arg6[%c0_35, %c0_36] : memref<1x128xf32, #tpu.memory_space<vmem>>, vector<1x128xf32>
    %81 = vector.broadcast %80 : vector<1x128xf32> to vector<128x128xf32>
    %82 = arith.addf %79, %81 : vector<128x128xf32>
    %cst_37 = arith.constant 3.000000e+00 : f32
    %83 = vector.broadcast %cst_37 : f32 to vector<128x128xf32>
    %84 = arith.addf %82, %83 : vector<128x128xf32>
    %cst_38 = arith.constant 0.000000e+00 : f32
    %cst_39 = arith.constant 6.000000e+00 : f32
    %85 = vector.broadcast %cst_38 : f32 to vector<128x128xf32>
    %86 = arith.maximumf %85, %84 : vector<128x128xf32>
    %87 = vector.broadcast %cst_39 : f32 to vector<128x128xf32>
    %88 = arith.minimumf %87, %86 : vector<128x128xf32>
    %89 = arith.mulf %82, %88 : vector<128x128xf32>
    %cst_40 = arith.constant 0.166666672 : f32
    %90 = vector.broadcast %cst_40 : f32 to vector<128x128xf32>
    %91 = arith.mulf %89, %90 : vector<128x128xf32>
    %92 = vector.shape_cast %91 : vector<128x128xf32> to vector<8x16x128xf32>
    %c0_41 = arith.constant 0 : index
    %c0_42 = arith.constant 0 : index
    %c0_43 = arith.constant 0 : index
    %c0_44 = arith.constant 0 : index
    %93 = vector.load %arg7[%c0_41, %c0_42, %c0_43, %c0_44] : memref<1x8x16x128xf32, #tpu.memory_space<vmem>>, vector<1x8x16x128xf32>
    %94 = vector.shape_cast %93 : vector<1x8x16x128xf32> to vector<8x16x128xf32>
    %95 = vector.shape_cast %92 : vector<8x16x128xf32> to vector<1x8x16x128xf32>
    tpu.vector_store %arg7[%c0_41, %c0_42, %c0_43, %c0_44], %95 {strides = array<i32>} : memref<1x8x16x128xf32, #tpu.memory_space<vmem>>, vector<1x8x16x128xf32>,
    return
  }
  func.func @transform_1(%arg0: i32, %arg1: i32) -> (i32, i32, i32) {
    %c0_i32 = arith.constant 0 : i32
    %c0_i32_0 = arith.constant 0 : i32
    %c0_i32_1 = arith.constant 0 : i32
    %c0_i32_2 = arith.constant 0 : i32
    return %c0_i32, %c0_i32_0, %c0_i32_1 : i32, i32, i32
  }
  func.func @transform_2(%arg0: i32, %arg1: i32) -> (i32, i32) {
    %c0_i32 = arith.constant 0 : i32
    %c0_i32_0 = arith.constant 0 : i32
    %c0_i32_1 = arith.constant 0 : i32
    return %c0_i32, %c0_i32_0 : i32, i32
  }
  func.func @transform_3(%arg0: i32, %arg1: i32) -> (i32, i32) {
    %c0_i32 = arith.constant 0 : i32
    %c0_i32_0 = arith.constant 0 : i32
    %c0_i32_1 = arith.constant 0 : i32
    return %c0_i32, %c0_i32_0 : i32, i32
  }
  func.func @transform_4(%arg0: i32, %arg1: i32) -> (i32, i32) {
    %c0_i32 = arith.constant 0 : i32
    %c0_i32_0 = arith.constant 0 : i32
    %c0_i32_1 = arith.constant 0 : i32
    return %c0_i32, %c0_i32_0 : i32, i32
  }
  func.func @transform_5(%arg0: i32, %arg1: i32) -> (i32, i32, i32, i32) {
    %c0_i32 = arith.constant 0 : i32
    %c0_i32_0 = arith.constant 0 : i32
    %c0_i32_1 = arith.constant 0 : i32
    return %arg0, %arg1, %c0_i32, %c0_i32_0 : i32, i32, i32, i32
  }
}

</mosaic_0001>

<bundles_post_ra>
// kernel: tpu_custom_call.1
= control target key start
LH: loop header
LB: loop body
LE: loop exit
PB: predicated region body
PF: predicated region fallthrough
CT: control target
= control target key end

     0   :  { %10 = vsyncpa [#allocation5], 0  ;;  %s2720_s0 = inlined_call_operand.vmem [shape: f32[2,18,18,128], index: 0, kind: input, shape index: {}]   ;;  %s2721_s1 = inlined_call_operand.vmem [shape: f32[3,3,128], index: 1, kind: input, shape index: {}]   ;;  %s2722_s2 = inlined_call_operand.vmem [shape: f32[1,128], index: 2, kind: input, shape index: {}]   ;;  %s2723_s3 = inlined_call_operand.vmem [shape: bf16[128,128], index: 3, kind: input, shape index: {}]   ;;  %s2724_s4 = inlined_call_operand.vmem [shape: f32[1,128], index: 4, kind: input, shape index: {}]   ;;  %s2725_s5 = inlined_call_operand.hbm [shape: f32[2,16,16,128], index: 5, kind: output, shape index: {}]  }
   0x1   :  { %12 = vsyncpa [#allocation5 + $0x1], 0  ;;  %s1873_s18 = smov 0   ;;  %s1875_s19 = smov 0  }
   0x2   :  { %s1877_s20 = smov 0   ;;  %s1879_s21 = smov 0  }
   0x3   :  { %s1881_s22 = smov 0   ;;  %s1883_s23 = smov 0  }
   0x4   :  { %s1885_s24 = smov 0   ;;  %s1887_s25 = smov 0  }
   0x5 LB: > { %s1553_s26 = sadd.s32 4294967295, %s1839_s25   ;;  %s1554_s27 = sadd.s32 4294967294, %s1839_s25   ;;  %s1839_s25 = sphi %s1887_s25, %s18_s25   ;;  %s1835_s24 = sphi %s1885_s24, %s2734_s24   ;;  %s1831_s23 = sphi %s1883_s23, %s2733_s23   ;;  %s1827_s22 = sphi %s1881_s22, %s2732_s22   ;;  %s1823_s21 = sphi %s1879_s21, %s2731_s21   ;;  %s1819_s20 = sphi %s1877_s20, %s2730_s20   ;;  %s1815_s19 = sphi %s1875_s19, %s2729_s19   ;;  %s1811_s18 = sphi %s1873_s18, %s2728_s18  }
   0x6   : > { %s27_s28 = sadd.s32 1, %s1831_s23  ;;  %s30_s29 = sadd.s32 1, %s1835_s24 }
   0x7   : > { %p28_p0 = scmp.ge.s32.totalorder %s27_s28, 2  ;;  %p133_p1 = scmp.ne.s32.totalorder %s1819_s20, %s1815_s19 }
   0x8   : > { %p134_p2 = scmp.eq.s32.totalorder %s1553_s26, 3  ;;  %p139_p5 = scmp.ne.s32.totalorder %s1815_s19, %s1811_s18 }
   0x9   : > { %s2736_s28 = smov (%p28_p0, %s27_s28), 0  ;;  %s2738_s29 = smov (!%p28_p0, %s30_s29), %s1835_s24 }
   0xa   : > { %s119_s30 = ssub.s32 %s1831_s23, %s2736_s28  ;;  %p1924_p3 = por %p134_p2, %p133_p1 }
   0xb   : > { %p32_p4 = scmp.ge.s32.totalorder %s2738_s29, 2  ;;  %p140_p6 = scmp.eq.s32.totalorder %s1554_s27, 3 }
   0xc   : > { %p1556_p7 = scmp.ge.s32.totalorder %s1839_s25, 1  ;;  %p170_p9 = scmp.lt.s32.totalorder %s1839_s25, 5 }
   0xd   : > { %s2740_s29 = smov (%p32_p4, %s2738_s29), 0  ;;  %p1933_p8 = por %p140_p6, %p139_p5 }
   0xe   : > { %s118_s8 = ssub.s32 %s1835_s24, %s2740_s29  ;;  %s123_s9 = sadd.s32 1, %s1819_s20 }
   0xf   : > { %s120_s10 = sor.u32 %s119_s30, %s118_s8  ;;  %p171_p10 = pnand %p1556_p7, %p170_p9 }
  0x10   : > { %p121_p11 = scmp.eq.s32.totalorder %s120_s10, 0  ;;  %s188_s12 = sand.u32 (!%p171_p10), 1, %s1815_s19  }
  0x11   : > { %174 = sbr.rel (%p171_p10) target bundleno = 384 (0x180), region = 36  ;;  %s1948_s14 = sshll.u32 (!%p171_p10), %s188_s12, 7 }
  0x12   : > { %s1942_s11 = scalar_select %p121_p11, %s1819_s20, %s123_s9  }
  0x13   : > { %s1559_s13 = smul.u32 (!%p171_p10), 192, %s1823_s21  ;;  %s1987_s30 = scalar_lea.vmem (!%p171_p10), [#allocation4], %s1948_s14 }
  0x14   : > { %s194_s15 = smul.u32 (!%p171_p10), 432, %s1827_s22 }
  0x16   : > { %s195_s16 = sadd.s32 %s1559_s13, %s194_s15 }
  0x17   : > { %s1954_s27 = scalar_lea.vmem %s2720_s0, %s195_s16 }
  0x18   : > { %v209_v0 = vld [vmem:[%s1954_s27] sm:$0xff]  ;;  %v211_v1 = vld [vmem:[%s1954_s27 + $0x8] sm:$0xff]  ;;  %v213_v2 = vld [vmem:[%s1954_s27 + $0x18] sm:$0xff] }
  0x19   : > { %210 = vst [vmem:[#allocation2 + $0x40] sm:$0xff] %v209_v0  ;;  %v215_v3 = vld [vmem:[%s1954_s27 + $0x20] sm:$0xff]  ;;  %v217_v4 = vld [vmem:[%s1954_s27 + $0x30] sm:$0xff]  ;;  %v219_v5 = vld [vmem:[%s1954_s27 + $0x38] sm:$0xff] }
  0x1a   : > { %212 = vst [vmem:[#allocation2] sm:$0xff] %v211_v1  ;;  %v221_v6 = vld [vmem:[%s1954_s27 + $0x48] sm:$0xff]  ;;  %v223_v7 = vld [vmem:[%s1954_s27 + $0x50] sm:$0xff]  ;;  %v225_v8 = vld [vmem:[%s1954_s27 + $0x60] sm:$0xff] }
  0x1b   : > { %214 = vst [vmem:[#allocation2 + $0xb8] sm:$0xff] %v213_v2  ;;  %v227_v9 = vld [vmem:[%s1954_s27 + $0x68] sm:$0xff]  ;;  %v229_v10 = vld [vmem:[%s1954_s27 + $0x78] sm:$0xff]  ;;  %v231_v11 = vld [vmem:[%s1954_s27 + $0x80] sm:$0xff] }
  0x1c   : > { %216 = vst [vmem:[#allocation2 + $0x20] sm:$0xff] %v215_v3  ;;  %v233_v12 = vld [vmem:[%s1954_s27 + $0x90] sm:$0xff]  ;;  %v235_v13 = vld [vmem:[%s1954_s27 + $0x98] sm:$0xff]  ;;  %v237_v14 = vld [vmem:[%s1954_s27 + $0xa8] sm:$0xff] }
  0x1d   : > { %218 = vst [vmem:[#allocation2 + $0x78] sm:$0xff] %v217_v4  ;;  %v239_v15 = vld [vmem:[%s1954_s27 + $0xb0] sm:$0xff]  ;;  %v241_v16 = vld [vmem:[%s1954_s27 + $0xc0] sm:$0xff]  ;;  %v243_v17 = vld [vmem:[%s1954_s27 + $0xc8] sm:$0xff] }
  0x1e   : > { %220 = vst [vmem:[#allocation2 + $0x98] sm:$0xff] %v219_v5  ;;  %v245_v18 = vld [vmem:[%s1954_s27 + $0xd8] sm:$0xff]  ;;  %v247_v19 = vld [vmem:[%s1954_s27 + $0xe0] sm:$0xff]  ;;  %v1560_v20 = vld [vmem:[%s1954_s27 + $0x10] sm:$0x3] }
  0x1f   : > { %222 = vst [vmem:[#allocation2 + $0x48] sm:$0xff] %v221_v6  ;;  %v1561_v21 = vld [vmem:[%s1954_s27 + $0x28] sm:$0x3]  ;;  %v1562_v22 = vld [vmem:[%s1954_s27 + $0x40] sm:$0x3] }
  0x20   : > { %224 = vst [vmem:[#allocation2 + $0x68] sm:$0xff] %v223_v7  ;;  %v1563_v23 = vld [vmem:[%s1954_s27 + $0x58] sm:$0x3]  ;;  %v1564_v24 = vld [vmem:[%s1954_s27 + $0x70] sm:$0x3] }
  0x21   : > { %226 = vst [vmem:[#allocation2 + $0xc0] sm:$0xff] %v225_v8  ;;  %v1565_v25 = vld [vmem:[%s1954_s27 + $0x88] sm:$0x3]  ;;  %v1566_v26 = vld [vmem:[%s1954_s27 + $0xa0] sm:$0x3] }
  0x22   : > { %228 = vst [vmem:[#allocation2 + $0xc8] sm:$0xff] %v227_v9  ;;  %v1567_v27 = vld [vmem:[%s1954_s27 + $0xb8] sm:$0x3]  ;;  %v1568_v28 = vld [vmem:[%s1954_s27 + $0xd0] sm:$0x3] }
  0x23   : > { %230 = vst [vmem:[#allocation2 + $0xe8] sm:$0xff] %v229_v10  ;;  %v1569_v29 = vld [vmem:[%s1954_s27 + $0xe8] sm:$0x3] }
  0x24   : > { %232 = vst [vmem:[#allocation2 + $0x58] sm:$0xff] %v231_v11 }
  0x25   : > { %234 = vst [vmem:[#allocation2 + $0x90] sm:$0xff] %v233_v12 }
  0x26   : > { %236 = vst [vmem:[#allocation2 + $0x28] sm:$0xff] %v235_v13 }
  0x27   : > { %238 = vst [vmem:[#allocation2 + $0xa8] sm:$0xff] %v237_v14 }
  0x28   : > { %240 = vst [vmem:[#allocation2 + $0x60] sm:$0xff] %v239_v15 }
  0x29   : > { %242 = vst [vmem:[#allocation2 + $0x8] sm:$0xff] %v241_v16 }
  0x2a   : > { %244 = vst [vmem:[#allocation2 + $0xb0] sm:$0xff] %v243_v17 }
  0x2b   : > { %246 = vst [vmem:[#allocation2 + $0x70] sm:$0xff] %v245_v18 }
  0x2c   : > { %248 = vst [vmem:[#allocation2 + $0x18] sm:$0xff] %v247_v19 }
  0x2d   : > { %260 = vst [vmem:[#allocation2 + $0x50] sm:$0x3] %v1560_v20 }
  0x2e   : > { %262 = vst [vmem:[#allocation2 + $0x38] sm:$0x3] %v1561_v21 }
  0x2f   : > { %264 = vst [vmem:[#allocation2 + $0xd8] sm:$0x3] %v1562_v22 }
  0x30   : > { %266 = vst [vmem:[#allocation2 + $0x10] sm:$0x3] %v1563_v23 }
  0x31   : > { %268 = vst [vmem:[#allocation2 + $0x80] sm:$0x3] %v1564_v24 }
  0x32   : > { %270 = vst [vmem:[#allocation2 + $0xa0] sm:$0x3] %v1565_v25 }
  0x33   : > { %272 = vst [vmem:[#allocation2 + $0xe0] sm:$0x3] %v1566_v26 }
  0x34   : > { %274 = vst [vmem:[#allocation2 + $0x88] sm:$0x3] %v1567_v27 }
  0x35   : > { %276 = vst [vmem:[#allocation2 + $0xd0] sm:$0x3] %v1568_v28 }
  0x36   : > { %278 = vst [vmem:[#allocation2 + $0x30] sm:$0x3] %v1569_v29 }
  0x37   : > { %282 = vsyncadd [#allocation3], 2880 }
  0x38   : > { %1803 = dma.done.wait [#allocation3], 2880 }
  0x39   : > { %1804 = vsyncadd [#allocation3], 4294964416  ;;  %v1623_v30 = vld [vmem:[%s2723_s3 + $0x38] sm:$0xff]  ;;  %v1622_v31 = vld [vmem:[%s2723_s3 + $0x30] sm:$0xff]  ;;  %vm401_vm0 = vcmask 1046528   ;;  %vm524_vm1 = vcmask 1045504  }
  0x3a   : > { %1307 = vmatpush.bf16.msra.mxu0 %v1623_v30  ;;  %1625 = vmatpush.bf16.msra.mxu1 %v1623_v30  ;;  %v1621_v32 = vld [vmem:[%s2723_s3 + $0x28] sm:$0xff]  ;;  %v287_v33 = vld [vmem:[#allocation2 + $0x40] sm:$0xff]  ;;  %v289_v35 = vld [vmem:[#allocation2 + $0x50] sm:$0x3]  ;;  %s1624_s26 = sshll.u32 %s1823_s21, 4  ;;  %s1611_s27 = sshll.u32 %s1827_s22, 5 }
  0x3b   : > { %1626 = vmatpush.bf16.msra.mxu2 %v1623_v30  ;;  %1627 = vmatpush.bf16.msra.mxu3 %v1623_v30  ;;  %v288_v34 = vld [vmem:[#allocation2] sm:$0xff]  ;;  %v1998_v36 = vld [vmem:[#allocation2 + $0xb8] sm:$0xff]  ;;  %v2062_v6 = vld [vmem:[%s2721_s1 + $0x8] ss:$0 sm:$0xff]  ;;  %s1465_s8 = sadd.s32 %s1624_s26, %s1611_s27  ;;  %s1468_s21 = sshll.u32 %s1987_s30, 4  ;;  %s1469_s21 = int_to_ptr.vmem [resolvable:$true] %s1468_s21 }
  0x3c   : > { %v2000_v37 = vld [vmem:[#allocation2 + $0x20] sm:$0xff]  ;;  %v2031_v47 = vld [vmem:[#allocation2 + $0x38] sm:$0x3]  ;;  %v2070_v12 = vld [vmem:[%s2721_s1 + $0x9] ss:$0 sm:$0xff]  ;;  %s1612_s9 = sshll.u32 %s1465_s8, 3 }
  0x3d   : > { %v2005_v38 = vld [vmem:[%s2721_s1] ss:$0 sm:$0xff]  ;;  %v2010_v39 = vld [vmem:[%s2721_s1 + $0x1] ss:$0 sm:$0xff]  ;;  %v2015_v40 = vld [vmem:[%s2721_s1 + $0x2] ss:$0 sm:$0xff]  ;;  %s1467_s15 = scalar_lea.hbm %s2725_s5, %s1612_s9 }
  0x3e   : > { %1308 = vmatpush.bf16.msra.mxu0 %v1622_v31  ;;  %1628 = vmatpush.bf16.msra.mxu1 %v1622_v31  ;;  %v319_v41 = vmul.f32 %v2005_v38, %v287_v33  ;;  %v320_v42 = vmul.f32 %v2005_v38, %v288_v34  ;;  %v353_v43 = vmul.f32 %v2010_v39, %v287_v33  ;;  %v2024_v45 = vld [vmem:[%s2721_s1 + $0x4] ss:$0 sm:$0xff]  ;;  %v2029_v46 = vld [vmem:[%s2721_s1 + $0x5] ss:$0 sm:$0xff]  ;;  %v2047_v61 = vld [vmem:[%s2721_s1 + $0x6] ss:$0 sm:$0xff] }
  0x3f   : > { %1629 = vmatpush.bf16.msra.mxu2 %v1622_v31  ;;  %1630 = vmatpush.bf16.msra.mxu3 %v1622_v31  ;;  %v354_v44 = vmul.f32 %v2010_v39, %v288_v34  ;;  %v355_v48 = vmul.f32 %v2010_v39, %v289_v35  ;;  %v476_v49 = vmul.f32 %v2015_v40, %v287_v33  ;;  %v1620_v52 = vld [vmem:[%s2723_s3 + $0x20] sm:$0xff]  ;;  %v1619_v7 = vld [vmem:[%s2723_s3 + $0x18] sm:$0xff]  ;;  %v2089_v26 = vld [vmem:[%s2721_s1 + $0xa] ss:$0 sm:$0xff]  ;;  %s1470_s22 = sshll.u32 %s1467_s15, 4  ;;  %s1453_s16 = scalar_lea.sflag [#allocation5], %s188_s12  ;;  %s1471_s22 = int_to_ptr.hbm [resolvable:$true] %s1470_s22 }
  0x40   : > { %v477_v50 = vmul.f32 %v2015_v40, %v288_v34  ;;  %v478_v51 = vmul.f32 %v2015_v40, %v289_v35  ;;  %v402_v53 = vrot.slane %v353_v43, 1  ;;  %v600_v55 = vmul.f32 %v2024_v45, %v1998_v36  ;;  %v2076_v16 = vld [vmem:[#allocation2 + $0x78] sm:$0xff]  ;;  %v1618_v27 = vld [vmem:[%s2723_s3 + $0x10] sm:$0xff]  ;;  %s1757_s14 = sshra.s32 %s1471_s22, 4  ;;  %s1763_s8 = scalar_lea.hbm %s2725_s5, 512  ;;  %s1758_s14 = int_to_ptr.hbm [resolvable:$true] %s1757_s14 }
  0x41   : > { %v403_v54 = vrot.slane %v354_v44, 1  ;;  %v601_v56 = vmul.f32 %v2024_v45, %v2000_v37  ;;  %v405_v57 = vrot.slane %v355_v48, 1  ;;  %v525_v58 = vrot.slane %v476_v49, 2  ;;  %v2082_v21 = vld [vmem:[#allocation2 + $0x98] sm:$0xff]  ;;  %s1759_s17 = scalar_lea.hbm %s1758_s14, 128  ;;  %p1764_p1 = scmp.lt.s32.totalorder %s1758_s14, %s2725_s5 }
  0x42   : > { %1309 = vmatpush.bf16.msra.mxu0 %v1621_v32  ;;  %1631 = vmatpush.bf16.msra.mxu1 %v1621_v32  ;;  %v526_v59 = vrot.slane %v477_v50, 2  ;;  %v528_v60 = vrot.slane %v478_v51, 2  ;;  %v634_v63 = vmul.f32 %v2029_v46, %v1998_v36  ;;  %v635_v0 = vmul.f32 %v2029_v46, %v2000_v37  ;;  %p1760_p12 = scmp.ne.s32.totalorder %s1758_s14, %s1759_s17  ;;  %p1765_p2 = scmp.lt.s32.totalorder %s1763_s8, %s1759_s17 }
  0x43   : > { %1632 = vmatpush.bf16.msra.mxu2 %v1621_v32  ;;  %1633 = vmatpush.bf16.msra.mxu3 %v1621_v32  ;;  %v404_v62 = vsel %vm401_vm0, %v402_v53, %v403_v54  ;;  %v636_v1 = vmul.f32 %v2029_v46, %v2031_v47  ;;  %v406_v2 = vsel %vm401_vm0, %v403_v54, %v405_v57  ;;  %v2098_v32 = vld [vmem:[#allocation2 + $0xd8] sm:$0x3] }
  0x44   : > { %v458_v3 = vadd.f32 %v404_v62, %v319_v41  ;;  %v527_v4 = vsel %vm524_vm1, %v525_v58, %v526_v59  ;;  %v529_v5 = vsel %vm524_vm1, %v526_v59, %v528_v60  ;;  %v459_v8 = vadd.f32 %v406_v2, %v320_v42  ;;  %p1761_p13 = pnand %p1760_p12, %p1924_p3  ;;  %p1766_p4 = por %p1765_p2, %p1764_p1 }
  0x45   : > { %v682_v9 = vrot.slane %v634_v63, 1  ;;  %v683_v10 = vrot.slane %v635_v0, 1  ;;  %v685_v11 = vrot.slane %v636_v1, 1  ;;  %v756_v14 = vmul.f32 %v2047_v61, %v1998_v36 }
  0x46   : > { %1310 = vmatpush.bf16.msra.mxu0 %v1620_v52  ;;  %1634 = vmatpush.bf16.msra.mxu1 %v1620_v52  ;;  %v581_v13 = vadd.f32 %v527_v4, %v458_v3  ;;  %v757_v15 = vmul.f32 %v2047_v61, %v2000_v37  ;;  %v582_v17 = vadd.f32 %v529_v5, %v459_v8  ;;  %v2125_v4 = vld [vmem:[%s2722_s2] ss:$0 sm:$0xff]  ;;  %p1762_p0 = pneg %p1761_p13 }
  0x47   : > { %1635 = vmatpush.bf16.msra.mxu2 %v1620_v52  ;;  %1636 = vmatpush.bf16.msra.mxu3 %v1620_v52  ;;  %v684_v18 = vsel %vm401_vm0, %v682_v9, %v683_v10  ;;  %v686_v19 = vsel %vm401_vm0, %v683_v10, %v685_v11  ;;  %v758_v20 = vmul.f32 %v2047_v61, %v2031_v47  ;;  %v804_v23 = vrot.slane %v756_v14, 2  ;;  %v1617_v52 = vld [vmem:[%s2723_s3 + $0x8] sm:$0xff]  ;;  %v1616_v8 = vld [vmem:[%s2723_s3] sm:$0xff] }
  0x48   : > { %v616_v22 = vadd.f32 %v600_v55, %v581_v13  ;;  %v805_v24 = vrot.slane %v757_v15, 2  ;;  %v879_v25 = vmul.f32 %v2062_v6, %v2076_v16  ;;  %v617_v28 = vadd.f32 %v601_v56, %v582_v17  ;;  %v2135_v11 = vld [vmem:[#allocation2 + $0x48] sm:$0xff]  ;;  %p1767_p5 = pnand %p1766_p4, %p1762_p0 }
  0x49   : > { %v807_v29 = vrot.slane %v758_v20, 2  ;;  %v880_v30 = vmul.f32 %v2062_v6, %v2082_v21  ;;  %v913_v31 = vmul.f32 %v2070_v12, %v2076_v16  ;;  %v914_v35 = vmul.f32 %v2070_v12, %v2082_v21  ;;  %v2141_v20 = vld [vmem:[#allocation2 + $0x68] sm:$0xff] }
  0x4a   : > { %1311 = vmatpush.bf16.msra.mxu0 %v1619_v7  ;;  %1637 = vmatpush.bf16.msra.mxu1 %v1619_v7  ;;  %v738_v33 = vadd.f32 %v684_v18, %v616_v22  ;;  %v806_v34 = vsel %vm524_vm1, %v804_v23, %v805_v24  ;;  %v739_v41 = vadd.f32 %v686_v19, %v617_v28 }
  0x4b   : > { %1638 = vmatpush.bf16.msra.mxu2 %v1619_v7  ;;  %1639 = vmatpush.bf16.msra.mxu3 %v1619_v7  ;;  %v808_v42 = vsel %vm524_vm1, %v805_v24, %v807_v29  ;;  %v915_v43 = vmul.f32 %v2070_v12, %v2098_v32  ;;  %v961_v44 = vrot.slane %v913_v31, 1  ;;  %v962_v49 = vrot.slane %v914_v35, 1  ;;  %v2152_v31 = vld [vmem:[#allocation2 + $0x10] sm:$0x3] }
  0x4c   : > { %v860_v48 = vadd.f32 %v806_v34, %v738_v33  ;;  %v1035_v50 = vmul.f32 %v2089_v26, %v2076_v16  ;;  %v1036_v51 = vmul.f32 %v2089_v26, %v2082_v21  ;;  %v861_v53 = vadd.f32 %v808_v42, %v739_v41 }
  0x4d   : > { %v964_v54 = vrot.slane %v915_v43, 1  ;;  %v1037_v55 = vmul.f32 %v2089_v26, %v2098_v32  ;;  %v323_v56 = vmul.f32 %v2005_v38, %v2076_v16  ;;  %v963_v58 = vsel %vm401_vm0, %v961_v44, %v962_v49 }
  0x4e   : > { %1312 = vmatpush.bf16.msra.mxu0 %v1618_v27  ;;  %1640 = vmatpush.bf16.msra.mxu1 %v1618_v27  ;;  %v895_v57 = vadd.f32 %v879_v25, %v860_v48  ;;  %v1083_v59 = vrot.slane %v1035_v50, 2  ;;  %v1084_v60 = vrot.slane %v1036_v51, 2  ;;  %v896_v62 = vadd.f32 %v880_v30, %v861_v53 }
  0x4f   : > { %1641 = vmatpush.bf16.msra.mxu2 %v1618_v27  ;;  %1642 = vmatpush.bf16.msra.mxu3 %v1618_v27  ;;  %v965_v63 = vsel %vm401_vm0, %v962_v49, %v964_v54  ;;  %v1086_v0 = vrot.slane %v1037_v55, 2  ;;  %v324_v1 = vmul.f32 %v2005_v38, %v2082_v21  ;;  %v359_v5 = vmul.f32 %v2010_v39, %v2076_v16 }
  0x50   : > { %v1017_v2 = vadd.f32 %v963_v58, %v895_v57  ;;  %v1085_v3 = vsel %vm524_vm1, %v1083_v59, %v1084_v60  ;;  %v360_v7 = vmul.f32 %v2010_v39, %v2082_v21  ;;  %v1018_v9 = vadd.f32 %v965_v63, %v896_v62 }
  0x51   : > { %v1087_v10 = vsel %vm524_vm1, %v1084_v60, %v1086_v0  ;;  %v361_v13 = vmul.f32 %v2010_v39, %v2098_v32  ;;  %v412_v15 = vrot.slane %v359_v5, 1  ;;  %v482_v18 = vmul.f32 %v2015_v40, %v2076_v16 }
  0x52   : > { %1313 = vmatpush.bf16.msra.mxu0 %v1617_v52  ;;  %1643 = vmatpush.bf16.msra.mxu1 %v1617_v52  ;;  %v1139_v14 = vadd.f32 %v1085_v3, %v1017_v2  ;;  %v413_v17 = vrot.slane %v360_v7, 1  ;;  %v1140_v19 = vadd.f32 %v1087_v10, %v1018_v9  ;;  %v483_v23 = vmul.f32 %v2015_v40, %v2082_v21  ;;  %v2172_v7 = vld [vmem:[#allocation2 + $0xc0] sm:$0xff] }
  0x53   : > { %1644 = vmatpush.bf16.msra.mxu2 %v1617_v52  ;;  %1645 = vmatpush.bf16.msra.mxu3 %v1617_v52  ;;  %v415_v22 = vrot.slane %v361_v13, 1  ;;  %v484_v24 = vmul.f32 %v2015_v40, %v2098_v32  ;;  %v535_v28 = vrot.slane %v482_v18, 2  ;;  %v604_v29 = vmul.f32 %v2024_v45, %v2135_v11 }
  0x54   : > { %v1159_v25 = vadd.f32 %v2125_v4, %v1139_v14  ;;  %v414_v27 = vsel %vm401_vm0, %v412_v15, %v413_v17  ;;  %v1160_v30 = vadd.f32 %v2125_v4, %v1140_v19  ;;  %v536_v35 = vrot.slane %v483_v23, 2  ;;  %v2177_v15 = vld [vmem:[#allocation2 + $0x80] sm:$0x3] }
  0x55   : > { %v416_v33 = vsel %vm401_vm0, %v413_v17, %v415_v22  ;;  %v462_v34 = vadd.f32 %v414_v27, %v323_v56  ;;  %v538_v43 = vrot.slane %v484_v24, 2  ;;  %v605_v44 = vmul.f32 %v2024_v45, %v2141_v20 }
  0x56   : > { %1314 = vmatpush.bf16.msra.mxu0 %v1616_v8  ;;  %1646 = vmatpush.bf16.msra.mxu1 %v1616_v8  ;;  %v1175_v41 = vpack.c.bf16 %v1159_v25, %v1159_v25  ;;  %v463_v42 = vadd.f32 %v416_v33, %v324_v1  ;;  %v1176_v48 = vpack.c.bf16 %v1160_v30, %v1160_v30 }
  0x57   : > { %1647 = vmatpush.bf16.msra.mxu2 %v1616_v8  ;;  %1648 = vmatpush.bf16.msra.mxu3 %v1616_v8  ;;  %v537_v49 = vsel %vm524_vm1, %v535_v28, %v536_v35  ;;  %v640_v50 = vmul.f32 %v2029_v46, %v2135_v11  ;;  %v641_v51 = vmul.f32 %v2029_v46, %v2141_v20  ;;  %v2174_v8 = vld [vmem:[#allocation2 + $0xc8] sm:$0xff] }
  0x58   : > { %v1227_v52 = vunpack.c.l.b16 %v1175_v41  ;;  %v539_v53 = vsel %vm524_vm1, %v536_v35, %v538_v43  ;;  %v585_v54 = vadd.f32 %v537_v49, %v462_v34  ;;  %v642_v55 = vmul.f32 %v2029_v46, %v2152_v31 }
  0x59   : > { %v1228_v56 = vunpack.c.l.b16 %v1176_v48  ;;  %v586_v57 = vadd.f32 %v539_v53, %v463_v42  ;;  %v692_v58 = vrot.slane %v640_v50, 1  ;;  %v693_v59 = vrot.slane %v641_v51, 1 }
  0x5a   : > { %v620_v60 = vadd.f32 %v604_v29, %v585_v54  ;;  %v695_v62 = vrot.slane %v642_v55, 1  ;;  %v762_v63 = vmul.f32 %v2047_v61, %v2135_v11  ;;  %v763_v0 = vmul.f32 %v2047_v61, %v2141_v20 }
  0x5b   : > { %v1243_v1 = vpack.c.b16 %v1228_v56, %v1227_v52  ;;  %v621_v2 = vadd.f32 %v605_v44, %v586_v57  ;;  %v694_v3 = vsel %vm401_vm0, %v692_v58, %v693_v59  ;;  %v764_v5 = vmul.f32 %v2047_v61, %v2152_v31 }
  0x5c   : > { %v696_v9 = vsel %vm401_vm0, %v693_v59, %v695_v62  ;;  %v742_v10 = vadd.f32 %v694_v3, %v620_v60  ;;  %v814_v13 = vrot.slane %v762_v63, 2  ;;  %v815_v14 = vrot.slane %v763_v0, 2 }
  0x5d   : > { %1315 = vmatmul.bf16.vlgmr.msra.gmra.mxu0 %v1243_v1  ;;  %v743_v17 = vadd.f32 %v696_v9, %v621_v2  ;;  %v817_v18 = vrot.slane %v764_v5, 2  ;;  %v883_v19 = vmul.f32 %v2062_v6, %v2172_v7  ;;  %v884_v22 = vmul.f32 %v2062_v6, %v2174_v8  ;;  %v2211_v1 = vld [vmem:[#allocation2 + $0xe8] sm:$0xff] }
  0x5e   : > { %v816_v23 = vsel %vm524_vm1, %v814_v13, %v815_v14  ;;  %v919_v24 = vmul.f32 %v2070_v12, %v2172_v7  ;;  %v920_v25 = vmul.f32 %v2070_v12, %v2174_v8  ;;  %v921_v27 = vmul.f32 %v2070_v12, %v2177_v15 }
  0x5f   : > { %v818_v28 = vsel %vm524_vm1, %v815_v14, %v817_v18  ;;  %v864_v29 = vadd.f32 %v816_v23, %v742_v10  ;;  %v1041_v30 = vmul.f32 %v2089_v26, %v2172_v7  ;;  %v1042_v33 = vmul.f32 %v2089_v26, %v2174_v8 }
  0x60   : > { %v865_v34 = vadd.f32 %v818_v28, %v743_v17  ;;  %v971_v35 = vrot.slane %v919_v24, 1  ;;  %v972_v41 = vrot.slane %v920_v25, 1  ;;  %v974_v42 = vrot.slane %v921_v27, 1  ;;  %v2218_v17 = vld [vmem:[#allocation2 + $0x58] sm:$0xff]  ;;  %v2223_v24 = vld [vmem:[#allocation2 + $0xa0] sm:$0x3] }
  0x61   : > { %v899_v43 = vadd.f32 %v883_v19, %v864_v29  ;;  %v1043_v44 = vmul.f32 %v2089_v26, %v2177_v15  ;;  %v1093_v48 = vrot.slane %v1041_v30, 2  ;;  %v1094_v49 = vrot.slane %v1042_v33, 2 }
  0x62   : > { %v900_v50 = vadd.f32 %v884_v22, %v865_v34  ;;  %v973_v51 = vsel %vm401_vm0, %v971_v35, %v972_v41  ;;  %v975_v52 = vsel %vm401_vm0, %v972_v41, %v974_v42  ;;  %v327_v53 = vmul.f32 %v2005_v38, %v2172_v7 }
  0x63   : > { %v1021_v54 = vadd.f32 %v973_v51, %v899_v43  ;;  %v1095_v55 = vsel %vm524_vm1, %v1093_v48, %v1094_v49  ;;  %v1096_v56 = vrot.slane %v1043_v44, 2  ;;  %v328_v57 = vmul.f32 %v2005_v38, %v2174_v8 }
  0x64   : > { %v1022_v58 = vadd.f32 %v975_v52, %v900_v50  ;;  %v365_v59 = vmul.f32 %v2010_v39, %v2172_v7  ;;  %v366_v60 = vmul.f32 %v2010_v39, %v2174_v8  ;;  %v367_v62 = vmul.f32 %v2010_v39, %v2177_v15 }
  0x65   : > { %v1097_v63 = vsel %vm524_vm1, %v1094_v49, %v1096_v56  ;;  %v1143_v0 = vadd.f32 %v1095_v55, %v1021_v54  ;;  %v488_v2 = vmul.f32 %v2015_v40, %v2172_v7  ;;  %v489_v3 = vmul.f32 %v2015_v40, %v2174_v8 }
  0x66   : > { %v1144_v5 = vadd.f32 %v1097_v63, %v1022_v58  ;;  %v422_v9 = vrot.slane %v365_v59, 1  ;;  %v423_v10 = vrot.slane %v366_v60, 1  ;;  %v425_v13 = vrot.slane %v367_v62, 1  ;;  %v2241_v60 = vld [vmem:[#allocation2 + $0x90] sm:$0xff] }
  0x67   : > { %v1163_v14 = vadd.f32 %v2125_v4, %v1143_v0  ;;  %v490_v18 = vmul.f32 %v2015_v40, %v2177_v15  ;;  %v545_v19 = vrot.slane %v488_v2, 2  ;;  %v546_v22 = vrot.slane %v489_v3, 2  ;;  %v2247_v2 = vld [vmem:[#allocation2 + $0x28] sm:$0xff] }
  0x68   : > { %v1164_v23 = vadd.f32 %v2125_v4, %v1144_v5  ;;  %v424_v25 = vsel %vm401_vm0, %v422_v9, %v423_v10  ;;  %v426_v27 = vsel %vm401_vm0, %v423_v10, %v425_v13  ;;  %v608_v28 = vmul.f32 %v2024_v45, %v2211_v1  ;;  %v2253_v13 = vld [vmem:[#allocation2 + $0xe0] sm:$0x3] }
  0x69   : > { %v1179_v29 = vpack.c.bf16 %v1163_v14, %v1163_v14  ;;  %v466_v30 = vadd.f32 %v424_v25, %v327_v53  ;;  %v467_v33 = vadd.f32 %v426_v27, %v328_v57  ;;  %v547_v34 = vsel %vm524_vm1, %v545_v19, %v546_v22 }
  0x6a   : > { %v1180_v35 = vpack.c.bf16 %v1164_v23, %v1164_v23  ;;  %v548_v41 = vrot.slane %v490_v18, 2  ;;  %v609_v42 = vmul.f32 %v2024_v45, %v2218_v17  ;;  %v646_v43 = vmul.f32 %v2029_v46, %v2211_v1 }
  0x6b   : > { %v1231_v44 = vunpack.c.l.b16 %v1179_v29  ;;  %v589_v48 = vadd.f32 %v547_v34, %v466_v30  ;;  %v647_v49 = vmul.f32 %v2029_v46, %v2218_v17  ;;  %v648_v50 = vmul.f32 %v2029_v46, %v2223_v24 }
  0x6c   : > { %v1232_v51 = vunpack.c.l.b16 %v1180_v35  ;;  %v549_v52 = vsel %vm524_vm1, %v546_v22, %v548_v41  ;;  %v702_v53 = vrot.slane %v646_v43, 1  ;;  %v768_v54 = vmul.f32 %v2047_v61, %v2211_v1 }
  0x6d   : > { %v590_v55 = vadd.f32 %v549_v52, %v467_v33  ;;  %v624_v56 = vadd.f32 %v608_v28, %v589_v48  ;;  %v703_v57 = vrot.slane %v647_v49, 1  ;;  %v705_v58 = vrot.slane %v648_v50, 1 }
  0x6e   : > { %v1245_v59 = vpack.c.b16 %v1232_v51, %v1231_v44  ;;  %v769_v62 = vmul.f32 %v2047_v61, %v2218_v17  ;;  %v770_v63 = vmul.f32 %v2047_v61, %v2223_v24  ;;  %v824_v0 = vrot.slane %v768_v54, 2 }
  0x6f   : > { %v625_v3 = vadd.f32 %v609_v42, %v590_v55  ;;  %v704_v5 = vsel %vm401_vm0, %v702_v53, %v703_v57  ;;  %v706_v9 = vsel %vm401_vm0, %v703_v57, %v705_v58  ;;  %v887_v10 = vmul.f32 %v2062_v6, %v2241_v60 }
  0x70   : > { %1325 = vmatmul.bf16.vlgmr.msra.gmra.mxu1 %v1245_v59  ;;  %v746_v14 = vadd.f32 %v704_v5, %v624_v56  ;;  %v825_v18 = vrot.slane %v769_v62, 2  ;;  %v827_v19 = vrot.slane %v770_v63, 2  ;;  %v888_v22 = vmul.f32 %v2062_v6, %v2247_v2  ;;  %v2283_v5 = vld [vmem:[#allocation2 + $0xa8] sm:$0xff] }
  0x71   : > { %v747_v23 = vadd.f32 %v706_v9, %v625_v3  ;;  %v925_v25 = vmul.f32 %v2070_v12, %v2241_v60  ;;  %v926_v27 = vmul.f32 %v2070_v12, %v2247_v2  ;;  %v927_v28 = vmul.f32 %v2070_v12, %v2253_v13 }
  0x72   : > { %v826_v29 = vsel %vm524_vm1, %v824_v0, %v825_v18  ;;  %v828_v30 = vsel %vm524_vm1, %v825_v18, %v827_v19  ;;  %v1047_v33 = vmul.f32 %v2089_v26, %v2241_v60  ;;  %v1048_v34 = vmul.f32 %v2089_v26, %v2247_v2 }
  0x73   : > { %v868_v35 = vadd.f32 %v826_v29, %v746_v14  ;;  %v869_v41 = vadd.f32 %v828_v30, %v747_v23  ;;  %v981_v42 = vrot.slane %v925_v25, 1  ;;  %v982_v43 = vrot.slane %v926_v27, 1  ;;  %v2291_v25 = vld [vmem:[#allocation2 + $0x60] sm:$0xff] }
  0x74   : > { %v984_v44 = vrot.slane %v927_v28, 1  ;;  %v1049_v48 = vmul.f32 %v2089_v26, %v2253_v13  ;;  %v1103_v49 = vrot.slane %v1047_v33, 2  ;;  %v1104_v50 = vrot.slane %v1048_v34, 2 }
  0x75   : > { %v903_v51 = vadd.f32 %v887_v10, %v868_v35  ;;  %v904_v52 = vadd.f32 %v888_v22, %v869_v41  ;;  %v983_v53 = vsel %vm401_vm0, %v981_v42, %v982_v43  ;;  %v331_v54 = vmul.f32 %v2005_v38, %v2241_v60  ;;  %v2300_v42 = vld [vmem:[#allocation2 + $0x88] sm:$0x3] }
  0x76   : > { %v985_v55 = vsel %vm401_vm0, %v982_v43, %v984_v44  ;;  %v1105_v56 = vsel %vm524_vm1, %v1103_v49, %v1104_v50  ;;  %v1106_v57 = vrot.slane %v1049_v48, 2  ;;  %v332_v58 = vmul.f32 %v2005_v38, %v2247_v2 }
  0x77   : > { %v1025_v59 = vadd.f32 %v983_v53, %v903_v51  ;;  %v1026_v62 = vadd.f32 %v985_v55, %v904_v52  ;;  %v371_v63 = vmul.f32 %v2010_v39, %v2241_v60  ;;  %v372_v0 = vmul.f32 %v2010_v39, %v2247_v2 }
  0x78   : > { %v1107_v3 = vsel %vm524_vm1, %v1104_v50, %v1106_v57  ;;  %v373_v9 = vmul.f32 %v2010_v39, %v2253_v13  ;;  %v494_v10 = vmul.f32 %v2015_v40, %v2241_v60  ;;  %v495_v14 = vmul.f32 %v2015_v40, %v2247_v2 }
  0x79   : > { %v1147_v18 = vadd.f32 %v1105_v56, %v1025_v59  ;;  %v1148_v19 = vadd.f32 %v1107_v3, %v1026_v62  ;;  %v432_v22 = vrot.slane %v371_v63, 1  ;;  %v433_v23 = vrot.slane %v372_v0, 1  ;;  %v2311_v63 = vld [vmem:[#allocation2 + $0x8] sm:$0xff]  ;;  %v2315_v3 = vld [vmem:[#allocation2 + $0xb0] sm:$0xff] }
  0x7a   : > { %v435_v27 = vrot.slane %v373_v9, 1  ;;  %v496_v28 = vmul.f32 %v2015_v40, %v2253_v13  ;;  %v555_v29 = vrot.slane %v494_v10, 2  ;;  %v556_v30 = vrot.slane %v495_v14, 2 }
  0x7b   : > { %v1167_v33 = vadd.f32 %v2125_v4, %v1147_v18  ;;  %v1168_v34 = vadd.f32 %v2125_v4, %v1148_v19  ;;  %v434_v35 = vsel %vm401_vm0, %v432_v22, %v433_v23  ;;  %v612_v41 = vmul.f32 %v2024_v45, %v2283_v5 }
  0x7c   : > { %v436_v43 = vsel %vm401_vm0, %v433_v23, %v435_v27  ;;  %v470_v44 = vadd.f32 %v434_v35, %v331_v54  ;;  %v557_v48 = vsel %vm524_vm1, %v555_v29, %v556_v30  ;;  %v558_v49 = vrot.slane %v496_v28, 2  ;;  %v2321_v28 = vld [vmem:[#allocation2 + $0xd0] sm:$0x3] }
  0x7d   : > { %v1183_v50 = vpack.c.bf16 %v1167_v33, %v1167_v33  ;;  %v1184_v51 = vpack.c.bf16 %v1168_v34, %v1168_v34  ;;  %v471_v52 = vadd.f32 %v436_v43, %v332_v58  ;;  %v613_v53 = vmul.f32 %v2024_v45, %v2291_v25 }
  0x7e   : > { %v559_v55 = vsel %vm524_vm1, %v556_v30, %v558_v49  ;;  %v593_v56 = vadd.f32 %v557_v48, %v470_v44  ;;  %v652_v57 = vmul.f32 %v2029_v46, %v2283_v5  ;;  %v653_v59 = vmul.f32 %v2029_v46, %v2291_v25 }
  0x7f   : > { %v1235_v62 = vunpack.c.l.b16 %v1183_v50  ;;  %v1236_v54 = vunpack.c.l.b16 %v1184_v51  ;;  %v594_v0 = vadd.f32 %v559_v55, %v471_v52  ;;  %v654_v58 = vmul.f32 %v2029_v46, %v2300_v42 }
  0x80   : > { %v628_v9 = vadd.f32 %v612_v41, %v593_v56  ;;  %v712_v10 = vrot.slane %v652_v57, 1  ;;  %v713_v14 = vrot.slane %v653_v59, 1  ;;  %v774_v18 = vmul.f32 %v2047_v61, %v2283_v5 }
  0x81   : > { %v1247_v19 = vpack.c.b16 %v1236_v54, %v1235_v62  ;;  %v629_v22 = vadd.f32 %v613_v53, %v594_v0  ;;  %v715_v23 = vrot.slane %v654_v58, 1  ;;  %v775_v27 = vmul.f32 %v2047_v61, %v2291_v25 }
  0x82   : > { %v714_v29 = vsel %vm401_vm0, %v712_v10, %v713_v14  ;;  %v776_v30 = vmul.f32 %v2047_v61, %v2300_v42  ;;  %v834_v33 = vrot.slane %v774_v18, 2  ;;  %v891_v34 = vmul.f32 %v2062_v6, %v2311_v63 }
  0x83   : > { %1335 = vmatmul.bf16.vlgmr.msra.gmra.mxu2 %v1247_v19  ;;  %v716_v35 = vsel %vm401_vm0, %v713_v14, %v715_v23  ;;  %v750_v41 = vadd.f32 %v714_v29, %v628_v9  ;;  %v835_v43 = vrot.slane %v775_v27, 2  ;;  %v892_v44 = vmul.f32 %v2062_v6, %v2315_v3 }
  0x84   : > { %v751_v48 = vadd.f32 %v716_v35, %v629_v22  ;;  %v837_v49 = vrot.slane %v776_v30, 2  ;;  %v931_v50 = vmul.f32 %v2070_v12, %v2311_v63  ;;  %v932_v51 = vmul.f32 %v2070_v12, %v2315_v3 }
  0x85   : > { %v836_v52 = vsel %vm524_vm1, %v834_v33, %v835_v43  ;;  %v933_v53 = vmul.f32 %v2070_v12, %v2321_v28  ;;  %v1053_v55 = vmul.f32 %v2089_v26, %v2311_v63  ;;  %v1054_v56 = vmul.f32 %v2089_v26, %v2315_v3 }
  0x86   : > { %v838_v57 = vsel %vm524_vm1, %v835_v43, %v837_v49  ;;  %v872_v59 = vadd.f32 %v836_v52, %v750_v41  ;;  %v991_v62 = vrot.slane %v931_v50, 1  ;;  %v992_v54 = vrot.slane %v932_v51, 1 }
  0x87   : > { %v873_v0 = vadd.f32 %v838_v57, %v751_v48  ;;  %v994_v58 = vrot.slane %v933_v53, 1  ;;  %v1055_v9 = vmul.f32 %v2089_v26, %v2321_v28  ;;  %v1113_v10 = vrot.slane %v1053_v55, 2 }
  0x88   : > { %v907_v14 = vadd.f32 %v891_v34, %v872_v59  ;;  %v993_v18 = vsel %vm401_vm0, %v991_v62, %v992_v54  ;;  %v1114_v19 = vrot.slane %v1054_v56, 2  ;;  %v321_v22 = vmul.f32 %v2005_v38, %v1998_v36 }
  0x89   : > { %v908_v23 = vadd.f32 %v892_v44, %v873_v0  ;;  %v995_v27 = vsel %vm401_vm0, %v992_v54, %v994_v58  ;;  %v1116_v29 = vrot.slane %v1055_v9, 2  ;;  %v322_v30 = vmul.f32 %v2005_v38, %v2000_v37 }
  0x8a   : > { %v1029_v33 = vadd.f32 %v993_v18, %v907_v14  ;;  %v1115_v35 = vsel %vm524_vm1, %v1113_v10, %v1114_v19  ;;  %v356_v41 = vmul.f32 %v2010_v39, %v1998_v36  ;;  %v357_v34 = vmul.f32 %v2010_v39, %v2000_v37 }
  0x8b   : > { %v1030_v43 = vadd.f32 %v995_v27, %v908_v23  ;;  %v1117_v48 = vsel %vm524_vm1, %v1114_v19, %v1116_v29  ;;  %v358_v44 = vmul.f32 %v2010_v39, %v2031_v47  ;;  %v479_v49 = vmul.f32 %v2015_v40, %v1998_v36 }
  0x8c   : > { %v1151_v50 = vadd.f32 %v1115_v35, %v1029_v33  ;;  %v407_v51 = vrot.slane %v356_v41, 1  ;;  %v408_v52 = vrot.slane %v357_v34, 1  ;;  %v480_v53 = vmul.f32 %v2015_v40, %v2000_v37 }
  0x8d   : > { %v1152_v55 = vadd.f32 %v1117_v48, %v1030_v43  ;;  %v410_v56 = vrot.slane %v358_v44, 1  ;;  %v481_v57 = vmul.f32 %v2015_v40, %v2031_v47  ;;  %v530_v59 = vrot.slane %v479_v49, 2 }
  0x8e   : > { %v1171_v62 = vadd.f32 %v2125_v4, %v1151_v50  ;;  %v409_v54 = vsel %vm401_vm0, %v407_v51, %v408_v52  ;;  %v531_v0 = vrot.slane %v480_v53, 2  ;;  %v602_v36 = vmul.f32 %v2024_v45, %v2076_v16 }
  0x8f   : > { %v1172_v58 = vadd.f32 %v2125_v4, %v1152_v55  ;;  %v411_v9 = vsel %vm401_vm0, %v408_v52, %v410_v56  ;;  %v460_v10 = vadd.f32 %v409_v54, %v321_v22  ;;  %v533_v37 = vrot.slane %v481_v57, 2 }
  0x90   : > { %v1187_v14 = vpack.c.bf16 %v1171_v62, %v1171_v62  ;;  %v461_v18 = vadd.f32 %v411_v9, %v322_v30  ;;  %v532_v19 = vsel %vm524_vm1, %v530_v59, %v531_v0  ;;  %v603_v47 = vmul.f32 %v2024_v45, %v2082_v21 }
  0x91   : > { %v1188_v23 = vpack.c.bf16 %v1172_v58, %v1172_v58  ;;  %v534_v27 = vsel %vm524_vm1, %v531_v0, %v533_v37  ;;  %v583_v29 = vadd.f32 %v532_v19, %v460_v10  ;;  %v637_v33 = vmul.f32 %v2029_v46, %v2076_v16 }
  0x92   : > { %v1239_v35 = vunpack.c.l.b16 %v1187_v14  ;;  %v584_v41 = vadd.f32 %v534_v27, %v461_v18  ;;  %v638_v22 = vmul.f32 %v2029_v46, %v2082_v21  ;;  %v639_v30 = vmul.f32 %v2029_v46, %v2098_v32 }
  0x93   : > { %v1240_v34 = vunpack.c.l.b16 %v1188_v23  ;;  %v618_v43 = vadd.f32 %v602_v36, %v583_v29  ;;  %v687_v48 = vrot.slane %v637_v33, 1  ;;  %v759_v44 = vmul.f32 %v2047_v61, %v2076_v16 }
  0x94   : > { %v619_v49 = vadd.f32 %v603_v47, %v584_v41  ;;  %v688_v50 = vrot.slane %v638_v22, 1  ;;  %v690_v51 = vrot.slane %v639_v30, 1  ;;  %v760_v52 = vmul.f32 %v2047_v61, %v2082_v21 }
  0x95   : > { %v1249_v53 = vpack.c.b16 %v1240_v34, %v1239_v35  ;;  %v761_v55 = vmul.f32 %v2047_v61, %v2098_v32  ;;  %v809_v56 = vrot.slane %v759_v44, 2  ;;  %v881_v57 = vmul.f32 %v2062_v6, %v2135_v11 }
  0x96   : > { %v689_v59 = vsel %vm401_vm0, %v687_v48, %v688_v50  ;;  %v691_v62 = vsel %vm401_vm0, %v688_v50, %v690_v51  ;;  %v810_v54 = vrot.slane %v760_v52, 2  ;;  %v882_v16 = vmul.f32 %v2062_v6, %v2141_v20 }
  0x97   : > { %1345 = vmatmul.bf16.vlgmr.msra.gmra.mxu3 %v1249_v53  ;;  %v740_v0 = vadd.f32 %v689_v59, %v618_v43  ;;  %v741_v36 = vadd.f32 %v691_v62, %v619_v49  ;;  %v812_v21 = vrot.slane %v761_v55, 2  ;;  %v916_v58 = vmul.f32 %v2070_v12, %v2135_v11 }
  0x98   : > { %v811_v32 = vsel %vm524_vm1, %v809_v56, %v810_v54  ;;  %v917_v9 = vmul.f32 %v2070_v12, %v2141_v20  ;;  %v918_v10 = vmul.f32 %v2070_v12, %v2152_v31  ;;  %v1038_v37 = vmul.f32 %v2089_v26, %v2135_v11 }
  0x99   : > { %v813_v14 = vsel %vm524_vm1, %v810_v54, %v812_v21  ;;  %v862_v18 = vadd.f32 %v811_v32, %v740_v0  ;;  %v966_v19 = vrot.slane %v916_v58, 1  ;;  %v1039_v47 = vmul.f32 %v2089_v26, %v2141_v20 }
  0x9a   : > { %v863_v23 = vadd.f32 %v813_v14, %v741_v36  ;;  %v967_v27 = vrot.slane %v917_v9, 1  ;;  %v969_v29 = vrot.slane %v918_v10, 1  ;;  %v1040_v33 = vmul.f32 %v2089_v26, %v2152_v31 }
  0x9b   : > { %v897_v35 = vadd.f32 %v881_v57, %v862_v18  ;;  %v1088_v41 = vrot.slane %v1038_v37, 2  ;;  %v1089_v22 = vrot.slane %v1039_v47, 2  ;;  %v325_v30 = vmul.f32 %v2005_v38, %v2135_v11 }
  0x9c   : > { %v898_v34 = vadd.f32 %v882_v16, %v863_v23  ;;  %v968_v43 = vsel %vm401_vm0, %v966_v19, %v967_v27  ;;  %v970_v48 = vsel %vm401_vm0, %v967_v27, %v969_v29  ;;  %v1091_v44 = vrot.slane %v1040_v33, 2 }
  0x9d   : > { %v1019_v49 = vadd.f32 %v968_v43, %v897_v35  ;;  %v1090_v50 = vsel %vm524_vm1, %v1088_v41, %v1089_v22  ;;  %v326_v51 = vmul.f32 %v2005_v38, %v2141_v20  ;;  %v362_v52 = vmul.f32 %v2010_v39, %v2135_v11 }
  0x9e   : > { %v1020_v53 = vadd.f32 %v970_v48, %v898_v34  ;;  %v1092_v55 = vsel %vm524_vm1, %v1089_v22, %v1091_v44  ;;  %v363_v56 = vmul.f32 %v2010_v39, %v2141_v20  ;;  %v364_v57 = vmul.f32 %v2010_v39, %v2152_v31 }
  0x9f   : > { %v1141_v59 = vadd.f32 %v1090_v50, %v1019_v49  ;;  %v417_v62 = vrot.slane %v362_v52, 1  ;;  %v485_v54 = vmul.f32 %v2015_v40, %v2135_v11  ;;  %v486_v38 = vmul.f32 %v2015_v40, %v2141_v20 }
  0xa0   : > { %v1142_v16 = vadd.f32 %v1092_v55, %v1020_v53  ;;  %v418_v0 = vrot.slane %v363_v56, 1  ;;  %v420_v36 = vrot.slane %v364_v57, 1  ;;  %v487_v21 = vmul.f32 %v2015_v40, %v2152_v31 }
  0xa1   : > { %v1161_v58 = vadd.f32 %v2125_v4, %v1141_v59  ;;  %v540_v32 = vrot.slane %v485_v54, 2  ;;  %v541_v9 = vrot.slane %v486_v38, 2  ;;  %v606_v39 = vmul.f32 %v2024_v45, %v2172_v7 }
  0xa2   : > { %v1162_v10 = vadd.f32 %v2125_v4, %v1142_v16  ;;  %v419_v11 = vsel %vm401_vm0, %v417_v62, %v418_v0  ;;  %v421_v37 = vsel %vm401_vm0, %v418_v0, %v420_v36  ;;  %v543_v20 = vrot.slane %v487_v21, 2 }
  0xa3   : > { %v1177_v14 = vpack.c.bf16 %v1161_v58, %v1161_v58  ;;  %v464_v18 = vadd.f32 %v419_v11, %v325_v30  ;;  %v465_v19 = vadd.f32 %v421_v37, %v326_v51  ;;  %v542_v47 = vsel %vm524_vm1, %v540_v32, %v541_v9 }
  0xa4   : > { %v1178_v40 = vpack.c.bf16 %v1162_v10, %v1162_v10  ;;  %v544_v31 = vsel %vm524_vm1, %v541_v9, %v543_v20  ;;  %v607_v23 = vmul.f32 %v2024_v45, %v2174_v8  ;;  %v643_v27 = vmul.f32 %v2029_v46, %v2172_v7 }
  0xa5   : > { %v1229_v29 = vunpack.c.l.b16 %v1177_v14  ;;  %v587_v33 = vadd.f32 %v542_v47, %v464_v18  ;;  %v588_v35 = vadd.f32 %v544_v31, %v465_v19  ;;  %v644_v41 = vmul.f32 %v2029_v46, %v2174_v8  ;;  %v2483_v31 = vld [vmem:[%s2721_s1 + $0x1] ss:$0 sm:$0xff] }
  0xa6   : > { %v1230_v22 = vunpack.c.l.b16 %v1178_v40  ;;  %v645_v30 = vmul.f32 %v2029_v46, %v2177_v15  ;;  %v697_v34 = vrot.slane %v643_v27, 1  ;;  %v765_v43 = vmul.f32 %v2047_v61, %v2172_v7 }
  0xa7   : > { %v622_v48 = vadd.f32 %v606_v39, %v587_v33  ;;  %v623_v44 = vadd.f32 %v607_v23, %v588_v35  ;;  %v698_v45 = vrot.slane %v644_v41, 1  ;;  %v766_v49 = vmul.f32 %v2047_v61, %v2174_v8 }
  0xa8   : > { %v1244_v50 = vpack.c.b16 %v1230_v22, %v1229_v29  ;;  %v700_v51 = vrot.slane %v645_v30, 1  ;;  %v767_v52 = vmul.f32 %v2047_v61, %v2177_v15  ;;  %v819_v53 = vrot.slane %v765_v43, 2 }
  0xa9   : > { %v699_v55 = vsel %vm401_vm0, %v697_v34, %v698_v45  ;;  %v820_v56 = vrot.slane %v766_v49, 2  ;;  %v885_v46 = vmul.f32 %v2062_v6, %v2211_v1  ;;  %v886_v7 = vmul.f32 %v2062_v6, %v2218_v17  ;;  %v2496_v34 = vld [vmem:[%s2721_s1 + $0x2] ss:$0 sm:$0xff] }
  0xaa   : > { %1320 = vmatmul.bf16.gmra.mxu0 %v1244_v50  ;;  %v701_v57 = vsel %vm401_vm0, %v698_v45, %v700_v51  ;;  %v744_v59 = vadd.f32 %v699_v55, %v622_v48  ;;  %v822_v8 = vrot.slane %v767_v52, 2  ;;  %v922_v62 = vmul.f32 %v2070_v12, %v2211_v1 }
  0xab   : > { %v745_v54 = vadd.f32 %v701_v57, %v623_v44  ;;  %v821_v61 = vsel %vm524_vm1, %v819_v53, %v820_v56  ;;  %v923_v15 = vmul.f32 %v2070_v12, %v2218_v17  ;;  %v924_v38 = vmul.f32 %v2070_v12, %v2223_v24  ;;  %v2472_v12 = vld [vmem:[%s2721_s1] ss:$0 sm:$0xff]  ;;  %v2508_v53 = vld [vmem:[%s2721_s1 + $0x4] ss:$0 sm:$0xff] }
  0xac   : > { %v823_v16 = vsel %vm524_vm1, %v820_v56, %v822_v8  ;;  %v866_v6 = vadd.f32 %v821_v61, %v744_v59  ;;  %v976_v0 = vrot.slane %v922_v62, 1  ;;  %v1044_v36 = vmul.f32 %v2089_v26, %v2211_v1  ;;  %v2521_v61 = vld [vmem:[%s2721_s1 + $0x5] ss:$0 sm:$0xff] }
  0xad   : > { %v867_v21 = vadd.f32 %v823_v16, %v745_v54  ;;  %v977_v58 = vrot.slane %v923_v15, 1  ;;  %v979_v32 = vrot.slane %v924_v38, 1  ;;  %v1045_v9 = vmul.f32 %v2089_v26, %v2218_v17 }
  0xae   : > { %v901_v39 = vadd.f32 %v885_v46, %v866_v6  ;;  %v1046_v10 = vmul.f32 %v2089_v26, %v2223_v24  ;;  %v1098_v11 = vrot.slane %v1044_v36, 2  ;;  %v329_v37 = vmul.f32 %v2472_v12, %v2211_v1 }
  0xaf   : > { %v902_v20 = vadd.f32 %v886_v7, %v867_v21  ;;  %v978_v14 = vsel %vm401_vm0, %v976_v0, %v977_v58  ;;  %v980_v18 = vsel %vm401_vm0, %v977_v58, %v979_v32  ;;  %v1099_v19 = vrot.slane %v1045_v9, 2 }
  0xb0   : > { %v1023_v47 = vadd.f32 %v978_v14, %v901_v39  ;;  %v1101_v40 = vrot.slane %v1046_v10, 2  ;;  %v330_v26 = vmul.f32 %v2472_v12, %v2218_v17  ;;  %v368_v23 = vmul.f32 %v2483_v31, %v2211_v1  ;;  %v2533_v10 = vld [vmem:[%s2721_s1 + $0x6] ss:$0 sm:$0xff] }
  0xb1   : > { %v1024_v27 = vadd.f32 %v980_v18, %v902_v20  ;;  %v1100_v29 = vsel %vm524_vm1, %v1098_v11, %v1099_v19  ;;  %v369_v33 = vmul.f32 %v2483_v31, %v2218_v17  ;;  %v370_v35 = vmul.f32 %v2483_v31, %v2223_v24 }
  0xb2   : > { %v1102_v41 = vsel %vm524_vm1, %v1099_v19, %v1101_v40  ;;  %v1145_v22 = vadd.f32 %v1100_v29, %v1023_v47  ;;  %v427_v30 = vrot.slane %v368_v23, 1  ;;  %v491_v43 = vmul.f32 %v2496_v34, %v2211_v1  ;;  %v2545_v23 = vld [vmem:[%s2721_s1 + $0x8] ss:$0 sm:$0xff] }
  0xb3   : > { %v1146_v48 = vadd.f32 %v1102_v41, %v1024_v27  ;;  %v428_v44 = vrot.slane %v369_v33, 1  ;;  %v430_v45 = vrot.slane %v370_v35, 1  ;;  %v492_v49 = vmul.f32 %v2496_v34, %v2218_v17  ;;  %v2556_v41 = vld [vmem:[%s2721_s1 + $0x9] ss:$0 sm:$0xff] }
  0xb4   : > { %v1165_v50 = vadd.f32 %v2125_v4, %v1145_v22  ;;  %v493_v51 = vmul.f32 %v2496_v34, %v2223_v24  ;;  %v550_v52 = vrot.slane %v491_v43, 2  ;;  %v610_v1 = vmul.f32 %v2508_v53, %v2241_v60 }
  0xb5   : > { %v1166_v55 = vadd.f32 %v2125_v4, %v1146_v48  ;;  %v429_v56 = vsel %vm401_vm0, %v427_v30, %v428_v44  ;;  %v431_v17 = vsel %vm401_vm0, %v428_v44, %v430_v45  ;;  %v551_v46 = vrot.slane %v492_v49, 2  ;;  %v2568_v45 = vld [vmem:[%s2721_s1 + $0xa] ss:$0 sm:$0xff] }
  0xb6   : > { %v1181_v7 = vpack.c.bf16 %v1165_v50, %v1165_v50  ;;  %v468_v57 = vadd.f32 %v429_v56, %v329_v37  ;;  %v469_v59 = vadd.f32 %v431_v17, %v330_v26  ;;  %v553_v24 = vrot.slane %v493_v51, 2 }
  0xb7   : > { %v1182_v8 = vpack.c.bf16 %v1166_v55, %v1166_v55  ;;  %v552_v62 = vsel %vm524_vm1, %v550_v52, %v551_v46  ;;  %v611_v54 = vmul.f32 %v2508_v53, %v2247_v2  ;;  %v649_v15 = vmul.f32 %v2521_v61, %v2241_v60 }
  0xb8   : > { %v1233_v38 = vunpack.c.l.b16 %v1181_v7  ;;  %v554_v16 = vsel %vm524_vm1, %v551_v46, %v553_v24  ;;  %v591_v6 = vadd.f32 %v552_v62, %v468_v57  ;;  %v650_v0 = vmul.f32 %v2521_v61, %v2247_v2 }
  0xb9   : > { %v1234_v36 = vunpack.c.l.b16 %v1182_v8  ;;  %v592_v21 = vadd.f32 %v554_v16, %v469_v59  ;;  %v651_v58 = vmul.f32 %v2521_v61, %v2253_v13  ;;  %v707_v32 = vrot.slane %v649_v15, 1 }
  0xba   : > { %v626_v9 = vadd.f32 %v610_v1, %v591_v6  ;;  %v708_v39 = vrot.slane %v650_v0, 1  ;;  %v771_v11 = vmul.f32 %v2533_v10, %v2241_v60  ;;  %v772_v37 = vmul.f32 %v2533_v10, %v2247_v2 }
  0xbb   : > { %v1246_v20 = vpack.c.b16 %v1234_v36, %v1233_v38  ;;  %v627_v14 = vadd.f32 %v611_v54, %v592_v21  ;;  %v710_v18 = vrot.slane %v651_v58, 1  ;;  %v773_v19 = vmul.f32 %v2533_v10, %v2253_v13 }
  0xbc   : > { %v709_v47 = vsel %vm401_vm0, %v707_v32, %v708_v39  ;;  %v829_v40 = vrot.slane %v771_v11, 2  ;;  %v830_v26 = vrot.slane %v772_v37, 2  ;;  %v889_v60 = vmul.f32 %v2545_v23, %v2283_v5 }
  0xbd   : > { %1330 = vmatmul.bf16.gmra.mxu1 %v1246_v20  ;;  %v711_v2 = vsel %vm401_vm0, %v708_v39, %v710_v18  ;;  %v748_v27 = vadd.f32 %v709_v47, %v626_v9  ;;  %v832_v29 = vrot.slane %v773_v19, 2  ;;  %v890_v13 = vmul.f32 %v2545_v23, %v2291_v25 }
  0xbe   : > { %v749_v33 = vadd.f32 %v711_v2, %v627_v14  ;;  %v831_v35 = vsel %vm524_vm1, %v829_v40, %v830_v26  ;;  %v928_v22 = vmul.f32 %v2556_v41, %v2283_v5  ;;  %v929_v30 = vmul.f32 %v2556_v41, %v2291_v25 }
  0xbf   : > { %v833_v43 = vsel %vm524_vm1, %v830_v26, %v832_v29  ;;  %v870_v48 = vadd.f32 %v831_v35, %v748_v27  ;;  %v930_v44 = vmul.f32 %v2556_v41, %v2300_v42  ;;  %v1050_v49 = vmul.f32 %v2568_v45, %v2283_v5 }
  0xc0   : > { %v871_v50 = vadd.f32 %v833_v43, %v749_v33  ;;  %v986_v51 = vrot.slane %v928_v22, 1  ;;  %v987_v52 = vrot.slane %v929_v30, 1  ;;  %v1051_v1 = vmul.f32 %v2568_v45, %v2291_v25  ;;  %v314_v22 = vld [vmem:[#allocation2 + $0x70] sm:$0xff] }
  0xc1   : > { %v905_v55 = vadd.f32 %v889_v60, %v870_v48  ;;  %v989_v56 = vrot.slane %v930_v44, 1  ;;  %v1052_v17 = vmul.f32 %v2568_v45, %v2300_v42  ;;  %v1108_v46 = vrot.slane %v1050_v49, 2  ;;  %v315_v44 = vld [vmem:[#allocation2 + $0x18] sm:$0xff] }
  0xc2   : > { %v906_v7 = vadd.f32 %v890_v13, %v871_v50  ;;  %v988_v57 = vsel %vm401_vm0, %v986_v51, %v987_v52  ;;  %v1109_v59 = vrot.slane %v1051_v1, 2  ;;  %v333_v24 = vmul.f32 %v2472_v12, %v2283_v5 }
  0xc3   : > { %v990_v8 = vsel %vm401_vm0, %v987_v52, %v989_v56  ;;  %v1027_v62 = vadd.f32 %v988_v57, %v905_v55  ;;  %v1111_v54 = vrot.slane %v1052_v17, 2  ;;  %v334_v15 = vmul.f32 %v2472_v12, %v2291_v25  ;;  %v316_v17 = vld [vmem:[#allocation2 + $0x30] sm:$0x3] }
  0xc4   : > { %v1028_v38 = vadd.f32 %v990_v8, %v906_v7  ;;  %v1110_v16 = vsel %vm524_vm1, %v1108_v46, %v1109_v59  ;;  %v374_v6 = vmul.f32 %v2483_v31, %v2283_v5  ;;  %v375_v0 = vmul.f32 %v2483_v31, %v2291_v25 }
  0xc5   : > { %v1112_v36 = vsel %vm524_vm1, %v1109_v59, %v1111_v54  ;;  %v1149_v21 = vadd.f32 %v1110_v16, %v1027_v62  ;;  %v376_v58 = vmul.f32 %v2483_v31, %v2300_v42  ;;  %v497_v32 = vmul.f32 %v2496_v34, %v2283_v5 }
  0xc6   : > { %v1150_v9 = vadd.f32 %v1112_v36, %v1028_v38  ;;  %v437_v12 = vrot.slane %v374_v6, 1  ;;  %v438_v39 = vrot.slane %v375_v0, 1  ;;  %v498_v11 = vmul.f32 %v2496_v34, %v2291_v25 }
  0xc7   : > { %v1169_v37 = vadd.f32 %v2125_v4, %v1149_v21  ;;  %v440_v20 = vrot.slane %v376_v58, 1  ;;  %v499_v14 = vmul.f32 %v2496_v34, %v2300_v42  ;;  %v560_v18 = vrot.slane %v497_v32, 2 }
  0xc8   : > { %v1170_v19 = vadd.f32 %v2125_v4, %v1150_v9  ;;  %v439_v31 = vsel %vm401_vm0, %v437_v12, %v438_v39  ;;  %v561_v47 = vrot.slane %v498_v11, 2  ;;  %v614_v5 = vmul.f32 %v2508_v53, %v2311_v63 }
  0xc9   : > { %v1185_v40 = vpack.c.bf16 %v1169_v37, %v1169_v37  ;;  %v441_v26 = vsel %vm401_vm0, %v438_v39, %v440_v20  ;;  %v472_v60 = vadd.f32 %v439_v31, %v333_v24  ;;  %v563_v25 = vrot.slane %v499_v14, 2 }
  0xca   : > { %v1186_v2 = vpack.c.bf16 %v1170_v19, %v1170_v19  ;;  %v473_v27 = vadd.f32 %v441_v26, %v334_v15  ;;  %v562_v29 = vsel %vm524_vm1, %v560_v18, %v561_v47  ;;  %v615_v42 = vmul.f32 %v2508_v53, %v2315_v3  ;;  %v1742_v26 = vld [vmem:[%s2722_s2] ss:$0 sm:$0xff] }
  0xcb   : > { %v1237_v34 = vunpack.c.l.b16 %v1185_v40  ;;  %v564_v4 = vsel %vm524_vm1, %v561_v47, %v563_v25  ;;  %v595_v13 = vadd.f32 %v562_v29, %v472_v60  ;;  %v655_v33 = vmul.f32 %v2521_v61, %v2311_v63 }
  0xcc   : > { %v1238_v35 = vunpack.c.l.b16 %v1186_v2  ;;  %v596_v30 = vadd.f32 %v564_v4, %v473_v27  ;;  %v656_v43 = vmul.f32 %v2521_v61, %v2315_v3  ;;  %v657_v48 = vmul.f32 %v2521_v61, %v2321_v28 }
  0xcd   : > { %v630_v49 = vadd.f32 %v614_v5, %v595_v13  ;;  %v717_v50 = vrot.slane %v655_v33, 1  ;;  %v777_v53 = vmul.f32 %v2533_v10, %v2311_v63  ;;  %v778_v51 = vmul.f32 %v2533_v10, %v2315_v3 }
  0xce   : > { %v1248_v52 = vpack.c.b16 %v1238_v35, %v1237_v34  ;;  %v631_v1 = vadd.f32 %v615_v42, %v596_v30  ;;  %v718_v55 = vrot.slane %v656_v43, 1  ;;  %v720_v56 = vrot.slane %v657_v48, 1 }
  0xcf   : > { %v779_v46 = vmul.f32 %v2533_v10, %v2321_v28  ;;  %v839_v7 = vrot.slane %v777_v53, 2  ;;  %v840_v57 = vrot.slane %v778_v51, 2  ;;  %v893_v61 = vmul.f32 %v2545_v23, %v314_v22 }
  0xd0   : > { %1340 = vmatmul.bf16.gmra.mxu2 %v1248_v52  ;;  %v719_v59 = vsel %vm401_vm0, %v717_v50, %v718_v55  ;;  %v721_v63 = vsel %vm401_vm0, %v718_v55, %v720_v56  ;;  %v894_v24 = vmul.f32 %v2545_v23, %v315_v44  ;;  %v934_v3 = vmul.f32 %v2556_v41, %v314_v22 }
  0xd1   : > { %v752_v8 = vadd.f32 %v719_v59, %v630_v49  ;;  %v753_v62 = vadd.f32 %v721_v63, %v631_v1  ;;  %v841_v54 = vsel %vm524_vm1, %v839_v7, %v840_v57  ;;  %v842_v15 = vrot.slane %v779_v46, 2 }
  0xd2   : > { %v935_v28 = vmul.f32 %v2556_v41, %v315_v44  ;;  %v936_v10 = vmul.f32 %v2556_v41, %v316_v17  ;;  %v996_v38 = vrot.slane %v934_v3, 1  ;;  %v1056_v16 = vmul.f32 %v2568_v45, %v314_v22 }
  0xd3   : > { %v843_v6 = vsel %vm524_vm1, %v840_v57, %v842_v15  ;;  %v874_v0 = vadd.f32 %v841_v54, %v752_v8  ;;  %v1057_v36 = vmul.f32 %v2568_v45, %v315_v44  ;;  %v1058_v23 = vmul.f32 %v2568_v45, %v316_v17  ;;  %v2637_v45 = vld [vmem:[%s2724_s4] ss:$0 sm:$0xff] }
  0xd4   : > { %v875_v21 = vadd.f32 %v843_v6, %v753_v62  ;;  %v997_v58 = vrot.slane %v935_v28, 1  ;;  %v999_v32 = vrot.slane %v936_v10, 1  ;;  %v1118_v9 = vrot.slane %v1056_v16, 2 }
  0xd5   : > { %v909_v12 = vadd.f32 %v893_v61, %v874_v0  ;;  %v1119_v39 = vrot.slane %v1057_v36, 2  ;;  %v1121_v11 = vrot.slane %v1058_v23, 2 }
  0xd6   : > { %v910_v37 = vadd.f32 %v894_v24, %v875_v21  ;;  %v998_v41 = vsel %vm401_vm0, %v996_v38, %v997_v58  ;;  %v1000_v20 = vsel %vm401_vm0, %v997_v58, %v999_v32 }
  0xd7   : > { %v1031_v14 = vadd.f32 %v998_v41, %v909_v12  ;;  %v1120_v18 = vsel %vm524_vm1, %v1118_v9, %v1119_v39  ;;  %v1122_v19 = vsel %vm524_vm1, %v1119_v39, %v1121_v11 }
  0xd8   : > { %v1032_v31 = vadd.f32 %v1000_v20, %v910_v37 }
  0xd9   : > { %v1153_v47 = vadd.f32 %v1120_v18, %v1031_v14 }
  0xda   : > { %v1154_v5 = vadd.f32 %v1122_v19, %v1032_v31  ;;  %v1316_v40 = vpop.f32.mrf.mxu0 }
  0xdb   : > { %v1173_v60 = vadd.f32 %v1742_v26, %v1153_v47  ;;  %v1317_v25 = vadd.f32 %v2637_v45, %v1316_v40 }
  0xdc   : > { %v1174_v2 = vadd.f32 %v1742_v26, %v1154_v5 }
  0xdd   : > { %v1189_v27 = vpack.c.bf16 %v1173_v60, %v1173_v60  ;;  %v1356_v29 = vadd.f32 3.0, %v1317_v25 }
  0xde   : > { %v1190_v42 = vpack.c.bf16 %v1174_v2, %v1174_v2 }
  0xdf   : > { %v1241_v34 = vunpack.c.l.b16 %v1189_v27  ;;  %v1372_v4 = vmax.f32 %v1356_v29, 0.0 }
  0xe0   : > { %v1242_v13 = vunpack.c.l.b16 %v1190_v42 }
  0xe1   : > { %v1388_v33 = vmin.f32 %v1372_v4, 6.0 }
  0xe2   : > { %v1250_v35 = vpack.c.b16 %v1242_v13, %v1241_v34  ;;  %v1318_v55 = vpop.f32.mrf.mxu0 }
  0xe3   : > { %v1404_v22 = vmul.f32 %v1388_v33, %v1317_v25  ;;  %v1319_v17 = vadd.f32 %v2637_v45, %v1318_v55 }
  0xe4   : > { %1350 = vmatmul.bf16.gmra.mxu3 %v1250_v35 }
  0xe5   : > { %v1420_v30 = vmul.f32 0.16666667, %v1404_v22  ;;  %v1357_v57 = vadd.f32 3.0, %v1319_v17 }
  0xe7   : > { %1436 = vst [vmem:[%s1987_s30] sm:$0xff] %v1420_v30  ;;  %v1373_v63 = vmax.f32 %v1357_v57, 0.0 }
  0xe9   : > { %v1389_v8 = vmin.f32 %v1373_v63, 6.0 }
  0xeb   : > { %v1405_v10 = vmul.f32 %v1389_v8, %v1319_v17 }
  0xed   : > { %v1326_v43 = vpop.f32.mrf.mxu1  ;;  %v1421_v0 = vmul.f32 0.16666667, %v1405_v10 }
  0xee   : > { %v1327_v48 = vadd.f32 %v2637_v45, %v1326_v43 }
  0xef   : > { %1437 = vst [vmem:[%s1987_s30 + $0x8] sm:$0xff] %v1421_v0 }
  0xf0   : > { %v1360_v44 = vadd.f32 3.0, %v1327_v48 }
  0xf2   : > { %v1376_v49 = vmax.f32 %v1360_v44, 0.0 }
  0xf4   : > { %v1392_v50 = vmin.f32 %v1376_v49, 6.0 }
  0xf5   : > { %v1328_v56 = vpop.f32.mrf.mxu1 }
  0xf6   : > { %v1408_v53 = vmul.f32 %v1392_v50, %v1327_v48  ;;  %v1329_v46 = vadd.f32 %v2637_v45, %v1328_v56 }
  0xf8   : > { %v1424_v51 = vmul.f32 0.16666667, %v1408_v53  ;;  %v1361_v61 = vadd.f32 3.0, %v1329_v46 }
  0xfa   : > { %1440 = vst [vmem:[%s1987_s30 + $0x20] sm:$0xff] %v1424_v51  ;;  %v1377_v24 = vmax.f32 %v1361_v61, 0.0 }
  0xfc   : > { %v1393_v62 = vmin.f32 %v1377_v24, 6.0 }
  0xfe   : > { %v1409_v38 = vmul.f32 %v1393_v62, %v1329_v46 }
 0x100   : > { %v1425_v36 = vmul.f32 0.16666667, %v1409_v38 }
 0x102   : > { %1441 = vst [vmem:[%s1987_s30 + $0x28] sm:$0xff] %v1425_v36 }
 0x106   : > { %v1336_v52 = vpop.f32.mrf.mxu2 }
 0x107   : > { %v1337_v1 = vadd.f32 %v2637_v45, %v1336_v52 }
 0x109   : > { %v1364_v7 = vadd.f32 3.0, %v1337_v1 }
 0x10b   : > { %v1380_v59 = vmax.f32 %v1364_v7, 0.0 }
 0x10d   : > { %v1396_v3 = vmin.f32 %v1380_v59, 6.0 }
 0x10e   : > { %v1338_v54 = vpop.f32.mrf.mxu2 }
 0x10f   : > { %v1412_v15 = vmul.f32 %v1396_v3, %v1337_v1  ;;  %v1339_v28 = vadd.f32 %v2637_v45, %v1338_v54 }
 0x111   : > { %v1428_v16 = vmul.f32 0.16666667, %v1412_v15  ;;  %v1365_v6 = vadd.f32 3.0, %v1339_v28 }
 0x113   : > { %1444 = vst [vmem:[%s1987_s30 + $0x40] sm:$0xff] %v1428_v16  ;;  %v1381_v23 = vmax.f32 %v1365_v6, 0.0 }
 0x115   : > { %v1397_v21 = vmin.f32 %v1381_v23, 6.0 }
 0x117   : > { %v1413_v58 = vmul.f32 %v1397_v21, %v1339_v28 }
 0x119   : > { %v1429_v32 = vmul.f32 0.16666667, %v1413_v58 }
 0x11a   : > { %v1346_v9 = vpop.f32.mrf.mxu3 }
 0x11b   : > { %v1347_v12 = vadd.f32 %v2637_v45, %v1346_v9  ;;  %1445 = vst [vmem:[%s1987_s30 + $0x48] sm:$0xff] %v1429_v32 }
 0x11d   : > { %v1368_v39 = vadd.f32 3.0, %v1347_v12 }
 0x11f   : > { %v1384_v11 = vmax.f32 %v1368_v39, 0.0 }
 0x121   : > { %v1400_v37 = vmin.f32 %v1384_v11, 6.0 }
 0x122   : > { %v1348_v41 = vpop.f32.mrf.mxu3 }
 0x123   : > { %v1416_v20 = vmul.f32 %v1400_v37, %v1347_v12  ;;  %v1349_v14 = vadd.f32 %v2637_v45, %v1348_v41 }
 0x125   : > { %v1432_v18 = vmul.f32 0.16666667, %v1416_v20  ;;  %v1369_v19 = vadd.f32 3.0, %v1349_v14 }
 0x127   : > { %1448 = vst [vmem:[%s1987_s30 + $0x60] sm:$0xff] %v1432_v18  ;;  %v1385_v31 = vmax.f32 %v1369_v19, 0.0  ;;  %v1321_v47 = vpop.f32.mrf.mxu0 }
 0x128   : > { %v1322_v5 = vadd.f32 %v2637_v45, %v1321_v47 }
 0x129   : > { %v1401_v40 = vmin.f32 %v1385_v31, 6.0 }
 0x12a   : > { %v1358_v26 = vadd.f32 3.0, %v1322_v5 }
 0x12b   : > { %v1417_v60 = vmul.f32 %v1401_v40, %v1349_v14 }
 0x12c   : > { %v1374_v25 = vmax.f32 %v1358_v26, 0.0 }
 0x12d   : > { %v1433_v2 = vmul.f32 0.16666667, %v1417_v60 }
 0x12e   : > { %v1390_v27 = vmin.f32 %v1374_v25, 6.0 }
 0x12f   : > { %1449 = vst [vmem:[%s1987_s30 + $0x68] sm:$0xff] %v1433_v2  ;;  %v1323_v43 = vpop.f32.mrf.mxu0 }
 0x130   : > { %v1406_v29 = vmul.f32 %v1390_v27, %v1322_v5  ;;  %v1324_v44 = vadd.f32 %v2637_v45, %v1323_v43 }
 0x132   : > { %v1422_v42 = vmul.f32 0.16666667, %v1406_v29  ;;  %v1359_v50 = vadd.f32 3.0, %v1324_v44 }
 0x134   : > { %1438 = vst [vmem:[%s1987_s30 + $0x10] sm:$0xff] %v1422_v42  ;;  %v1375_v51 = vmax.f32 %v1359_v50, 0.0 }
 0x136   : > { %v1391_v1 = vmin.f32 %v1375_v51, 6.0 }
 0x138   : > { %v1407_v56 = vmul.f32 %v1391_v1, %v1324_v44 }
 0x13a   : > { %v1331_v34 = vpop.f32.mrf.mxu1  ;;  %v1423_v57 = vmul.f32 0.16666667, %v1407_v56 }
 0x13b   : > { %v1332_v4 = vadd.f32 %v2637_v45, %v1331_v34 }
 0x13c   : > { %1439 = vst [vmem:[%s1987_s30 + $0x18] sm:$0xff] %v1423_v57 }
 0x13d   : > { %v1362_v13 = vadd.f32 3.0, %v1332_v4 }
 0x13f   : > { %v1378_v33 = vmax.f32 %v1362_v13, 0.0 }
 0x141   : > { %v1394_v35 = vmin.f32 %v1378_v33, 6.0 }
 0x142   : > { %v1333_v48 = vpop.f32.mrf.mxu1 }
 0x143   : > { %v1410_v22 = vmul.f32 %v1394_v35, %v1332_v4  ;;  %v1334_v49 = vadd.f32 %v2637_v45, %v1333_v48 }
 0x145   : > { %v1426_v30 = vmul.f32 0.16666667, %v1410_v22  ;;  %v1363_v53 = vadd.f32 3.0, %v1334_v49 }
 0x147   : > { %1442 = vst [vmem:[%s1987_s30 + $0x30] sm:$0xff] %v1426_v30  ;;  %v1379_v52 = vmax.f32 %v1363_v53, 0.0 }
 0x149   : > { %v1395_v55 = vmin.f32 %v1379_v52, 6.0 }
 0x14b   : > { %v1411_v17 = vmul.f32 %v1395_v55, %v1334_v49 }
 0x14d   : > { %v1427_v61 = vmul.f32 0.16666667, %v1411_v17 }
 0x14f   : > { %1443 = vst [vmem:[%s1987_s30 + $0x38] sm:$0xff] %v1427_v61 }
 0x153   : > { %v1341_v46 = vpop.f32.mrf.mxu2 }
 0x154   : > { %v1342_v7 = vadd.f32 %v2637_v45, %v1341_v46 }
 0x156   : > { %v1366_v59 = vadd.f32 3.0, %v1342_v7 }
 0x158   : > { %v1382_v63 = vmax.f32 %v1366_v59, 0.0 }
 0x15a   : > { %v1398_v24 = vmin.f32 %v1382_v63, 6.0 }
 0x15b   : > { %v1343_v3 = vpop.f32.mrf.mxu2 }
 0x15c   : > { %v1414_v8 = vmul.f32 %v1398_v24, %v1342_v7  ;;  %v1344_v62 = vadd.f32 %v2637_v45, %v1343_v3 }
 0x15e   : > { %v1430_v54 = vmul.f32 0.16666667, %v1414_v8  ;;  %v1367_v15 = vadd.f32 3.0, %v1344_v62 }
 0x160   : > { %1446 = vst [vmem:[%s1987_s30 + $0x50] sm:$0xff] %v1430_v54  ;;  %v1383_v28 = vmax.f32 %v1367_v15, 0.0 }
 0x162   : > { %v1399_v10 = vmin.f32 %v1383_v28, 6.0 }
 0x164   : > { %v1415_v38 = vmul.f32 %v1399_v10, %v1344_v62 }
 0x166   : > { %v1431_v16 = vmul.f32 0.16666667, %v1415_v38 }
 0x167   : > { %v1351_v6 = vpop.f32.mrf.mxu3 }
 0x168   : > { %v1352_v0 = vadd.f32 %v2637_v45, %v1351_v6  ;;  %1447 = vst [vmem:[%s1987_s30 + $0x58] sm:$0xff] %v1431_v16 }
 0x16a   : > { %v1370_v36 = vadd.f32 3.0, %v1352_v0 }
 0x16c   : > { %v1386_v23 = vmax.f32 %v1370_v36, 0.0 }
 0x16e   : > { %v1402_v21 = vmin.f32 %v1386_v23, 6.0 }
 0x16f   : > { %v1353_v58 = vpop.f32.mrf.mxu3 }
 0x170   : > { %v1418_v32 = vmul.f32 %v1402_v21, %v1352_v0  ;;  %v1354_v9 = vadd.f32 %v2637_v45, %v1353_v58 }
 0x172   : > { %v1434_v12 = vmul.f32 0.16666667, %v1418_v32  ;;  %v1371_v39 = vadd.f32 3.0, %v1354_v9 }
 0x174   : > { %1450 = vst [vmem:[%s1987_s30 + $0x70] sm:$0xff] %v1434_v12  ;;  %v1387_v11 = vmax.f32 %v1371_v39, 0.0 }
 0x176   : > { %v1403_v37 = vmin.f32 %v1387_v11, 6.0 }
 0x178   : > { %v1419_v41 = vmul.f32 %v1403_v37, %v1354_v9 }
 0x17a   : > { %v1435_v20 = vmul.f32 0.16666667, %v1419_v41 }
 0x17c   : > { %1451 = vst [vmem:[%s1987_s30 + $0x78] sm:$0xff] %v1435_v20 }
 0x17d   : > { %1770 = shalt.err (!%p1767_p5)
}
 0x17e   : > { %s1841_s12 = smov 128   ;;  %s1842_s30 = smov 8  }
 0x17f   : > { %1649 = dma.vmem_to_hbm [thread:$0]  (%p1924_p3), %s1469_s21, 2048, %s1471_s22, %s1453_s16, %s1841_s12, %s1841_s12, %s1842_s30  }
 0x180 PF: > { %p1655_p6 = scmp.ge.s32.totalorder %s1839_s25, 2  ;;  %s1485_s13 = sand.u32 1, %s1811_s18  }
 0x181   : > { %s1486_s15 = scalar_lea.sflag [#allocation5], %s1485_s13 }
 0x182   : > { %p1652_p7 = pnand %p1655_p6, %p1933_p8 }
 0x184   : > { %p1653_p9 = pneg %p1652_p7 }
 0x186   : > { %1806 = dma.done.wait (%p1653_p9), %s1486_s15, 2048  }
 0x187   : > { %1808 = vsyncadd (%p1653_p9), %s1486_s15, 4294965248  ;;  %s18_s25 = sadd.s32 1, %s1839_s25   ;;  %s2728_s18 = smov %s1815_s19 }
 0x188   : > { %p15_p10 = scmp.ge.s32.totalorder %s18_s25, 6   ;;  %s2729_s19 = smov %s1819_s20 }
 0x189   : > { %s2730_s20 = smov %s1942_s11  ;;  %s2731_s21 = smov %s1831_s23 }
 0x18a   : > { %s2732_s22 = smov %s1835_s24  ;;  %s2733_s23 = smov %s2736_s28 }
 0x18b   : > { %s2734_s24 = smov %s2740_s29  ;;  %17 = sbr.rel (!%p15_p10) target bundleno = 5 (0x5), region = 103 }
 0x190   :  { %1492 = vsyncpa [#allocation5], 1 }
 0x191   :  { %1494 = vsyncpa [#allocation5 + $0x1], 1 }
 0x192   :  { %1495 = vsyncmov [#allocation3] }
 0x195   :  { %s1496_s6 = vpop.sfrf %1495 }
 0x196   :  { %p1615_p3 = scmp.ne.s32.totalorder %s1496_s6, 0 }
 0x198   :  { %1500 = shalt.err (%p1615_p3)  }

</bundles_post_ra>
